<compile_context>
chip_gen: v6e
topology: v6e:2x2x1
jax: 0.10.0
libtpu: 0.0.40
codegen_flags: <defaults>
</compile_context>

<pallas_src>
import jax
import jax.numpy as jnp
from jax import lax
from jax.experimental import pallas as pl
from jax.experimental.pallas import tpu as pltpu

INPUT_SIZE = 6
HIDDEN_SIZE = 32
OUTPUT_SIZE = 2


def _gru_fc_kernel(x_ref, len_ref,
                   wic_ref, bic_ref,      # input-proj weights (F, 3H), fused biases (1, 3H)
                   whc_ref, bhn_ref,      # hidden weights (H, 3H), n-gate hidden bias (1, H)
                   wfc_ref, bfc_ref,      # fc weights (H, O), bias (1, O)
                   y_ref):                # output (B, T, O)
    B, T, F = x_ref.shape
    H = whc_ref.shape[0]
    O = wfc_ref.shape[1]

    # ---- hoisted, loop-invariant work --------------------------------------------------
    w_h = whc_ref[...]                                        # (H, 3H)
    b_hn = jnp.broadcast_to(bhn_ref[...], (B, H))             # broadcast once, not per step
    lens = len_ref[...]                                       # (B, 1) int32, loaded once

    # Input projection for every (b, t) position in a single MXU matmul (r/z biases
    # pre-folded): keeps only the hidden-state matmul on the recurrent critical path.
    xp_flat = jnp.dot(x_ref[...].reshape(B * T, F), wic_ref[...],
                      preferred_element_type=jnp.float32) + bic_ref[...]    # (B*T, 3H)
    xp_all = xp_flat.reshape(B, T, 3 * H)                     # leading/sublane split only

    # Time iota and validity mask built once (padded positions are t >= lengths[b]).
    t_iota = lax.broadcasted_iota(jnp.int32, (B, T, 1), 1)    # (B, T, 1)
    valid = t_iota < lens[:, :, None]                         # (B, T, 1) bool

    # ---- fully unrolled recurrence (static T) ------------------------------------------
    # GRU outputs are assembled into a register-resident (B, T, H) value with plain VPU
    # selects: no VMEM scratch and no partial-tile store/reload before the FC.
    h = jnp.zeros((B, H), jnp.float32)
    g_all = jnp.zeros((B, T, H), jnp.float32)
    for t in range(T):
        xp = xp_all[:, t, :]                                  # (B, 3H) static slice
        # Fused hidden-state matmul: the only op on the recurrent critical path.
        hw = jnp.dot(h, w_h, preferred_element_type=jnp.float32)           # (B, 3H)

        rz = jax.nn.sigmoid(xp[:, :2 * H] + hw[:, :2 * H])    # one EUP push over (B, 2H)
        r = rz[:, :H]
        z = rz[:, H:]
        n = jnp.tanh(xp[:, 2 * H:] + r * (hw[:, 2 * H:] + b_hn))
        h_new = (1.0 - z) * n + z * h

        # Packed-sequence semantics: freeze the hidden state once t >= lengths[b].
        h = jnp.where(t < lens, h_new, h)
        # Place this step's output at time index t (value stays in vregs).
        g_all = jnp.where(t_iota == t, h_new[:, None, :], g_all)

    # Zero padded positions once (instead of once per step), then apply the FC to every
    # position in a single matmul (padded rows -> fc bias) and store (B, T, O) directly.
    g_all = jnp.where(valid, g_all, 0.0)
    y = jnp.dot(g_all.reshape(B * T, H), wfc_ref[...],
                preferred_element_type=jnp.float32) + bfc_ref[...]          # (B*T, O)
    y_ref[...] = y.reshape(B, T, O)


def imu_to_trajectory_forward(x_btf, lengths, params, *, batch_tile=None):
    """x_btf: (B, T, F) f32; lengths: (B,) int32 descending with lengths[0] == T
    (enforce_sorted=True semantics). Returns (B, T, O)."""
    B, T, F = x_btf.shape
    H = HIDDEN_SIZE
    O = OUTPUT_SIZE

    x = x_btf.astype(jnp.float32)
    len_col = lengths.astype(jnp.int32).reshape(B, 1)

    # Batch grid axis: one program per batch tile.  grid=(1,) (a no-op) at small B; for
    # large batches on v7x the "parallel" axis lets both TensorCores split the batch.
    tb = B if batch_tile is None else batch_tile
    assert B % tb == 0, (B, tb)
    grid = (B // tb,)

    def _full_spec(shape):
        return pl.BlockSpec(shape, lambda i: (0,) * len(shape))

    w_i, b_i = params["w_i_cat"], params["b_i_cat"]
    w_h, b_hn = params["w_h_cat"], params["b_hn"]
    w_fc, b_fc = params["w_fc"], params["b_fc"]

    return pl.pallas_call(
        _gru_fc_kernel,
        out_shape=jax.ShapeDtypeStruct((B, T, O), jnp.float32),
        grid=grid,
        in_specs=[
            pl.BlockSpec((tb, T, F), lambda i: (i, 0, 0)),
            pl.BlockSpec((tb, 1), lambda i: (i, 0)),
            _full_spec(w_i.shape), _full_spec(b_i.shape),
            _full_spec(w_h.shape), _full_spec(b_hn.shape),
            _full_spec(w_fc.shape), _full_spec(b_fc.shape),
        ],
        out_specs=pl.BlockSpec((tb, T, O), lambda i: (i, 0, 0)),
        compiler_params=pltpu.CompilerParams(dimension_semantics=("parallel",)),
    )(x, len_col, w_i, b_i, w_h, b_hn, w_fc, b_fc)


def init_params(key, input_size=INPUT_SIZE, hidden_size=HIDDEN_SIZE,
                output_size=OUTPUT_SIZE):
    """PyTorch-shaped init (GRU/Linear weights U(-k, k), k = 1/sqrt(H)),
    repacked into concatenated, right-multiplication-ready matrices."""
    ks = jax.random.split(key, 6)
    H = hidden_size
    k = 1.0 / jnp.sqrt(jnp.float32(H))

    w_ih = jax.random.uniform(ks[0], (3 * H, input_size), jnp.float32, -k, k)   # rows r|z|n
    w_hh = jax.random.uniform(ks[1], (3 * H, H), jnp.float32, -k, k)
    b_ih = jax.random.uniform(ks[2], (3 * H,), jnp.float32, -k, k)
    b_hh = jax.random.uniform(ks[3], (3 * H,), jnp.float32, -k, k)
    w_fc = jax.random.uniform(ks[4], (output_size, H), jnp.float32, -k, k)
    b_fc = jax.random.uniform(ks[5], (output_size,), jnp.float32, -k, k)

    # Concatenated gate weights, transposed for (rows, F/H) @ (F/H, 3H), gate order r|z|n.
    w_i_cat = w_ih.T                                  # (F, 3H)
    w_h_cat = w_hh.T                                  # (H, 3H)
    # r/z biases pre-summed (input+hidden); n-gate input bias folded, hidden bias separate.
    b_i_cat = jnp.concatenate([
        b_ih[0 * H:1 * H] + b_hh[0 * H:1 * H],
        b_ih[1 * H:2 * H] + b_hh[1 * H:2 * H],
        b_ih[2 * H:3 * H],
    ]).reshape(1, 3 * H)
    b_hn = b_hh[2 * H:3 * H].reshape(1, H)

    return {
        "w_i_cat": w_i_cat, "b_i_cat": b_i_cat,
        "w_h_cat": w_h_cat, "b_hn": b_hn,
        "w_fc": w_fc.T,                    # (H, O)
        "b_fc": b_fc.reshape(1, output_size),
    }


def _reference_forward(x_btf, lengths, params):
    """Pure-JAX reference (lax.scan) for a correctness check."""
    B, T, F = x_btf.shape
    H = HIDDEN_SIZE
    w_i, b_i = params["w_i_cat"], params["b_i_cat"]
    w_h, b_hn = params["w_h_cat"], params["b_hn"]

    def step(h, inp):
        x_t, t = inp
        xp = x_t @ w_i + b_i
        hw = h @ w_h
        r = jax.nn.sigmoid(xp[:, :H] + hw[:, :H])
        z = jax.nn.sigmoid(xp[:, H:2 * H] + hw[:, H:2 * H])
        n = jnp.tanh(xp[:, 2 * H:] + r * (hw[:, 2 * H:] + b_hn))
        h_new = (1.0 - z) * n + z * h
        valid = (t < lengths).reshape(B, 1)
        return jnp.where(valid, h_new, h), jnp.where(valid, h_new, 0.0)

    x_tbf = jnp.transpose(x_btf, (1, 0, 2))
    _, outs = lax.scan(step, jnp.zeros((B, H), jnp.float32),
                       (x_tbf, jnp.arange(T, dtype=jnp.int32)))
    y = outs @ params["w_fc"] + params["b_fc"]          # (T, B, O)
    return jnp.transpose(y, (1, 0, 2))


if __name__ == "__main__":
    B, T, F = 2, 8, INPUT_SIZE

    key = jax.random.PRNGKey(0)
    k_x, k_p = jax.random.split(key)
    x = jax.random.normal(k_x, (B, T, F), dtype=jnp.float32)
    # enforce_sorted=True -> lengths descending; lengths[0] == T so the padded output
    # time dimension matches the input one (as pad_packed_sequence produces).
    lengths = jnp.array([8, 5], dtype=jnp.int32)

    params = init_params(k_p)

    y = jax.block_until_ready(imu_to_trajectory_forward(x, lengths, params))
    assert y.shape == (B, T, OUTPUT_SIZE), y.shape

    y_ref = jax.block_until_ready(_reference_forward(x, lengths, params))
    assert jnp.allclose(y, y_ref, rtol=1e-3, atol=1e-3), float(jnp.max(jnp.abs(y - y_ref)))

    print("KERNEL_OK")
</pallas_src>

<mosaic_0001>
module attributes {stable_mosaic.version = 11 : i64} {
  func.func @_gru_fc_kernel(%arg0: i32, %arg1: memref<2x8x6xf32, #tpu.memory_space<vmem>>, %arg2: memref<2x1xi32, #tpu.memory_space<vmem>>, %arg3: memref<6x96xf32, #tpu.memory_space<vmem>>, %arg4: memref<1x96xf32, #tpu.memory_space<vmem>>, %arg5: memref<32x96xf32, #tpu.memory_space<vmem>>, %arg6: memref<1x32xf32, #tpu.memory_space<vmem>>, %arg7: memref<32x2xf32, #tpu.memory_space<vmem>>, %arg8: memref<1x2xf32, #tpu.memory_space<vmem>>, %arg9: memref<2x8x2xf32, #tpu.memory_space<vmem>>) attributes {dimension_semantics = [#tpu.dimension_semantics<parallel>], iteration_bounds = array<i64: 1>, scalar_prefetch = 0 : i64, scratch_operands = 0 : i64, tpu.core_type = #tpu.core_type<tc>, window_params = [{transform_indices = @transform_0, window_bounds = array<i64: 2, 8, 6>}, {transform_indices = @transform_1, window_bounds = array<i64: 2, 1>}, {pipeline_mode = #tpu.pipeline_mode<synchronous>, transform_indices = @transform_2, window_bounds = array<i64: 6, 96>}, {pipeline_mode = #tpu.pipeline_mode<synchronous>, transform_indices = @transform_3, window_bounds = array<i64: 1, 96>}, {pipeline_mode = #tpu.pipeline_mode<synchronous>, transform_indices = @transform_4, window_bounds = array<i64: 32, 96>}, {pipeline_mode = #tpu.pipeline_mode<synchronous>, transform_indices = @transform_5, window_bounds = array<i64: 1, 32>}, {pipeline_mode = #tpu.pipeline_mode<synchronous>, transform_indices = @transform_6, window_bounds = array<i64: 32, 2>}, {pipeline_mode = #tpu.pipeline_mode<synchronous>, transform_indices = @transform_7, window_bounds = array<i64: 1, 2>}, {transform_indices = @transform_8, window_bounds = array<i64: 2, 8, 2>}]} {
    %c0 = arith.constant 0 : index
    %c0_0 = arith.constant 0 : index
    %0 = vector.load %arg5[%c0, %c0_0] : memref<32x96xf32, #tpu.memory_space<vmem>>, vector<32x96xf32>
    %c0_1 = arith.constant 0 : index
    %c0_2 = arith.constant 0 : index
    %1 = vector.load %arg6[%c0_1, %c0_2] : memref<1x32xf32, #tpu.memory_space<vmem>>, vector<1x32xf32>
    %2 = vector.shape_cast %1 : vector<1x32xf32> to vector<1x32xf32>
    %3 = vector.broadcast %2 : vector<1x32xf32> to vector<2x32xf32>
    %c0_3 = arith.constant 0 : index
    %c0_4 = arith.constant 0 : index
    %4 = vector.load %arg2[%c0_3, %c0_4] : memref<2x1xi32, #tpu.memory_space<vmem>>, vector<2x1xi32>
    %c0_5 = arith.constant 0 : index
    %c0_6 = arith.constant 0 : index
    %c0_7 = arith.constant 0 : index
    %5 = vector.load %arg1[%c0_5, %c0_6, %c0_7] : memref<2x8x6xf32, #tpu.memory_space<vmem>>, vector<2x8x6xf32>
    %6 = vector.shape_cast %5 : vector<2x8x6xf32> to vector<16x6xf32>
    %c0_8 = arith.constant 0 : index
    %c0_9 = arith.constant 0 : index
    %7 = vector.load %arg3[%c0_8, %c0_9] : memref<6x96xf32, #tpu.memory_space<vmem>>, vector<6x96xf32>
    %cst = arith.constant dense<0.000000e+00> : vector<16x96xf32>
    %8 = tpu.matmul %6, %7, %cst {dimension_numbers = #tpu.dot_dimension_numbers<[1], [0], [0], [1], [0, 0, 1, 1], [], []>} : vector<16x6xf32>, vector<6x96xf32>, vector<16x96xf32> -> vector<16x96xf32>
    %c0_10 = arith.constant 0 : index
    %c0_11 = arith.constant 0 : index
    %9 = vector.load %arg4[%c0_10, %c0_11] : memref<1x96xf32, #tpu.memory_space<vmem>>, vector<1x96xf32>
    %10 = vector.broadcast %9 : vector<1x96xf32> to vector<16x96xf32>
    %11 = arith.addf %8, %10 : vector<16x96xf32>
    %12 = vector.shape_cast %11 : vector<16x96xf32> to vector<2x8x96xf32>
    %13 = tpu.iota {dimensions = array<i32: 1>} : vector<2x8x1xi32>
    %14 = vector.shape_cast %4 : vector<2x1xi32> to vector<2x1x1xi32>
    %15 = vector.broadcast %14 : vector<2x1x1xi32> to vector<2x8x1xi32>
    %16 = arith.cmpi slt, %13, %15 : vector<2x8x1xi32>
    %cst_12 = arith.constant 0.000000e+00 : f32
    %17 = vector.broadcast %cst_12 : f32 to vector<2x32xf32>
    %cst_13 = arith.constant 0.000000e+00 : f32
    %18 = vector.broadcast %cst_13 : f32 to vector<2x8x32xf32>
    %19 = vector.extract_strided_slice %12 {offsets = [0, 0, 0], sizes = [2, 1, 96], strides = [1, 1, 1]} : vector<2x8x96xf32> to vector<2x1x96xf32>
    %20 = vector.shape_cast %19 : vector<2x1x96xf32> to vector<2x96xf32>
    %cst_14 = arith.constant dense<0.000000e+00> : vector<2x96xf32>
    %21 = tpu.matmul %17, %0, %cst_14 {dimension_numbers = #tpu.dot_dimension_numbers<[1], [0], [0], [1], [0, 0, 1, 1], [], []>} : vector<2x32xf32>, vector<32x96xf32>, vector<2x96xf32> -> vector<2x96xf32>
    %22 = vector.extract_strided_slice %20 {offsets = [0, 0], sizes = [2, 64], strides = [1, 1]} : vector<2x96xf32> to vector<2x64xf32>
    %23 = vector.extract_strided_slice %21 {offsets = [0, 0], sizes = [2, 64], strides = [1, 1]} : vector<2x96xf32> to vector<2x64xf32>
    %24 = arith.addf %22, %23 : vector<2x64xf32>
    %25 = arith.negf %24 : vector<2x64xf32>
    %26 = math.exp %25 : vector<2x64xf32>
    %cst_15 = arith.constant 1.000000e+00 : f32
    %27 = vector.broadcast %cst_15 : f32 to vector<2x64xf32>
    %28 = arith.addf %27, %26 : vector<2x64xf32>
    %29 = arith.divf %27, %28 : vector<2x64xf32>
    %30 = vector.extract_strided_slice %29 {offsets = [0, 0], sizes = [2, 32], strides = [1, 1]} : vector<2x64xf32> to vector<2x32xf32>
    %31 = vector.extract_strided_slice %29 {offsets = [0, 32], sizes = [2, 32], strides = [1, 1]} : vector<2x64xf32> to vector<2x32xf32>
    %32 = vector.extract_strided_slice %20 {offsets = [0, 64], sizes = [2, 32], strides = [1, 1]} : vector<2x96xf32> to vector<2x32xf32>
    %33 = vector.extract_strided_slice %21 {offsets = [0, 64], sizes = [2, 32], strides = [1, 1]} : vector<2x96xf32> to vector<2x32xf32>
    %34 = arith.addf %33, %3 : vector<2x32xf32>
    %35 = arith.mulf %30, %34 : vector<2x32xf32>
    %36 = arith.addf %32, %35 : vector<2x32xf32>
    %37 = math.tanh %36 : vector<2x32xf32>
    %cst_16 = arith.constant 1.000000e+00 : f32
    %38 = vector.broadcast %cst_16 : f32 to vector<2x32xf32>
    %39 = arith.subf %38, %31 : vector<2x32xf32>
    %40 = arith.mulf %39, %37 : vector<2x32xf32>
    %41 = arith.mulf %31, %17 : vector<2x32xf32>
    %42 = arith.addf %40, %41 : vector<2x32xf32>
    %c0_i32 = arith.constant 0 : i32
    %43 = vector.broadcast %c0_i32 : i32 to vector<2x1xi32>
    %44 = arith.cmpi sgt, %4, %43 : vector<2x1xi32>
    %45 = vector.shape_cast %44 : vector<2x1xi1> to vector<2x1xi1>
    %46 = vector.broadcast %45 : vector<2x1xi1> to vector<2x32xi1>
    %47 = arith.select %46, %42, %17 : vector<2x32xi1>, vector<2x32xf32>
    %c0_i32_17 = arith.constant 0 : i32
    %48 = vector.broadcast %c0_i32_17 : i32 to vector<2x8x1xi32>
    %49 = arith.cmpi eq, %13, %48 : vector<2x8x1xi32>
    %50 = vector.shape_cast %42 : vector<2x32xf32> to vector<2x1x32xf32>
    %51 = vector.shape_cast %49 : vector<2x8x1xi1> to vector<2x8x1xi1>
    %52 = vector.broadcast %51 : vector<2x8x1xi1> to vector<2x8x32xi1>
    %53 = vector.shape_cast %50 : vector<2x1x32xf32> to vector<2x1x32xf32>
    %54 = vector.broadcast %53 : vector<2x1x32xf32> to vector<2x8x32xf32>
    %55 = arith.select %52, %54, %18 : vector<2x8x32xi1>, vector<2x8x32xf32>
    %56 = vector.extract_strided_slice %12 {offsets = [0, 1, 0], sizes = [2, 1, 96], strides = [1, 1, 1]} : vector<2x8x96xf32> to vector<2x1x96xf32>
    %57 = vector.shape_cast %56 : vector<2x1x96xf32> to vector<2x96xf32>
    %cst_18 = arith.constant dense<0.000000e+00> : vector<2x96xf32>
    %58 = tpu.matmul %47, %0, %cst_18 {dimension_numbers = #tpu.dot_dimension_numbers<[1], [0], [0], [1], [0, 0, 1, 1], [], []>} : vector<2x32xf32>, vector<32x96xf32>, vector<2x96xf32> -> vector<2x96xf32>
    %59 = vector.extract_strided_slice %57 {offsets = [0, 0], sizes = [2, 64], strides = [1, 1]} : vector<2x96xf32> to vector<2x64xf32>
    %60 = vector.extract_strided_slice %58 {offsets = [0, 0], sizes = [2, 64], strides = [1, 1]} : vector<2x96xf32> to vector<2x64xf32>
    %61 = arith.addf %59, %60 : vector<2x64xf32>
    %62 = arith.negf %61 : vector<2x64xf32>
    %63 = math.exp %62 : vector<2x64xf32>
    %cst_19 = arith.constant 1.000000e+00 : f32
    %64 = vector.broadcast %cst_19 : f32 to vector<2x64xf32>
    %65 = arith.addf %64, %63 : vector<2x64xf32>
    %66 = arith.divf %64, %65 : vector<2x64xf32>
    %67 = vector.extract_strided_slice %66 {offsets = [0, 0], sizes = [2, 32], strides = [1, 1]} : vector<2x64xf32> to vector<2x32xf32>
    %68 = vector.extract_strided_slice %66 {offsets = [0, 32], sizes = [2, 32], strides = [1, 1]} : vector<2x64xf32> to vector<2x32xf32>
    %69 = vector.extract_strided_slice %57 {offsets = [0, 64], sizes = [2, 32], strides = [1, 1]} : vector<2x96xf32> to vector<2x32xf32>
    %70 = vector.extract_strided_slice %58 {offsets = [0, 64], sizes = [2, 32], strides = [1, 1]} : vector<2x96xf32> to vector<2x32xf32>
    %71 = arith.addf %70, %3 : vector<2x32xf32>
    %72 = arith.mulf %67, %71 : vector<2x32xf32>
    %73 = arith.addf %69, %72 : vector<2x32xf32>
    %74 = math.tanh %73 : vector<2x32xf32>
    %cst_20 = arith.constant 1.000000e+00 : f32
    %75 = vector.broadcast %cst_20 : f32 to vector<2x32xf32>
    %76 = arith.subf %75, %68 : vector<2x32xf32>
    %77 = arith.mulf %76, %74 : vector<2x32xf32>
    %78 = arith.mulf %68, %47 : vector<2x32xf32>
    %79 = arith.addf %77, %78 : vector<2x32xf32>
    %c1_i32 = arith.constant 1 : i32
    %80 = vector.broadcast %c1_i32 : i32 to vector<2x1xi32>
    %81 = arith.cmpi sgt, %4, %80 : vector<2x1xi32>
    %82 = vector.shape_cast %81 : vector<2x1xi1> to vector<2x1xi1>
    %83 = vector.broadcast %82 : vector<2x1xi1> to vector<2x32xi1>
    %84 = arith.select %83, %79, %47 : vector<2x32xi1>, vector<2x32xf32>
    %c1_i32_21 = arith.constant 1 : i32
    %85 = vector.broadcast %c1_i32_21 : i32 to vector<2x8x1xi32>
    %86 = arith.cmpi eq, %13, %85 : vector<2x8x1xi32>
    %87 = vector.shape_cast %79 : vector<2x32xf32> to vector<2x1x32xf32>
    %88 = vector.shape_cast %86 : vector<2x8x1xi1> to vector<2x8x1xi1>
    %89 = vector.broadcast %88 : vector<2x8x1xi1> to vector<2x8x32xi1>
    %90 = vector.shape_cast %87 : vector<2x1x32xf32> to vector<2x1x32xf32>
    %91 = vector.broadcast %90 : vector<2x1x32xf32> to vector<2x8x32xf32>
    %92 = arith.select %89, %91, %55 : vector<2x8x32xi1>, vector<2x8x32xf32>
    %93 = vector.extract_strided_slice %12 {offsets = [0, 2, 0], sizes = [2, 1, 96], strides = [1, 1, 1]} : vector<2x8x96xf32> to vector<2x1x96xf32>
    %94 = vector.shape_cast %93 : vector<2x1x96xf32> to vector<2x96xf32>
    %cst_22 = arith.constant dense<0.000000e+00> : vector<2x96xf32>
    %95 = tpu.matmul %84, %0, %cst_22 {dimension_numbers = #tpu.dot_dimension_numbers<[1], [0], [0], [1], [0, 0, 1, 1], [], []>} : vector<2x32xf32>, vector<32x96xf32>, vector<2x96xf32> -> vector<2x96xf32>
    %96 = vector.extract_strided_slice %94 {offsets = [0, 0], sizes = [2, 64], strides = [1, 1]} : vector<2x96xf32> to vector<2x64xf32>
    %97 = vector.extract_strided_slice %95 {offsets = [0, 0], sizes = [2, 64], strides = [1, 1]} : vector<2x96xf32> to vector<2x64xf32>
    %98 = arith.addf %96, %97 : vector<2x64xf32>
    %99 = arith.negf %98 : vector<2x64xf32>
    %100 = math.exp %99 : vector<2x64xf32>
    %cst_23 = arith.constant 1.000000e+00 : f32
    %101 = vector.broadcast %cst_23 : f32 to vector<2x64xf32>
    %102 = arith.addf %101, %100 : vector<2x64xf32>
    %103 = arith.divf %101, %102 : vector<2x64xf32>
    %104 = vector.extract_strided_slice %103 {offsets = [0, 0], sizes = [2, 32], strides = [1, 1]} : vector<2x64xf32> to vector<2x32xf32>
    %105 = vector.extract_strided_slice %103 {offsets = [0, 32], sizes = [2, 32], strides = [1, 1]} : vector<2x64xf32> to vector<2x32xf32>
    %106 = vector.extract_strided_slice %94 {offsets = [0, 64], sizes = [2, 32], strides = [1, 1]} : vector<2x96xf32> to vector<2x32xf32>
    %107 = vector.extract_strided_slice %95 {offsets = [0, 64], sizes = [2, 32], strides = [1, 1]} : vector<2x96xf32> to vector<2x32xf32>
    %108 = arith.addf %107, %3 : vector<2x32xf32>
    %109 = arith.mulf %104, %108 : vector<2x32xf32>
    %110 = arith.addf %106, %109 : vector<2x32xf32>
    %111 = math.tanh %110 : vector<2x32xf32>
    %cst_24 = arith.constant 1.000000e+00 : f32
    %112 = vector.broadcast %cst_24 : f32 to vector<2x32xf32>
    %113 = arith.subf %112, %105 : vector<2x32xf32>
    %114 = arith.mulf %113, %111 : vector<2x32xf32>
    %115 = arith.mulf %105, %84 : vector<2x32xf32>
    %116 = arith.addf %114, %115 : vector<2x32xf32>
    %c2_i32 = arith.constant 2 : i32
    %117 = vector.broadcast %c2_i32 : i32 to vector<2x1xi32>
    %118 = arith.cmpi sgt, %4, %117 : vector<2x1xi32>
    %119 = vector.shape_cast %118 : vector<2x1xi1> to vector<2x1xi1>
    %120 = vector.broadcast %119 : vector<2x1xi1> to vector<2x32xi1>
    %121 = arith.select %120, %116, %84 : vector<2x32xi1>, vector<2x32xf32>
    %c2_i32_25 = arith.constant 2 : i32
    %122 = vector.broadcast %c2_i32_25 : i32 to vector<2x8x1xi32>
    %123 = arith.cmpi eq, %13, %122 : vector<2x8x1xi32>
    %124 = vector.shape_cast %116 : vector<2x32xf32> to vector<2x1x32xf32>
    %125 = vector.shape_cast %123 : vector<2x8x1xi1> to vector<2x8x1xi1>
    %126 = vector.broadcast %125 : vector<2x8x1xi1> to vector<2x8x32xi1>
    %127 = vector.shape_cast %124 : vector<2x1x32xf32> to vector<2x1x32xf32>
    %128 = vector.broadcast %127 : vector<2x1x32xf32> to vector<2x8x32xf32>
    %129 = arith.select %126, %128, %92 : vector<2x8x32xi1>, vector<2x8x32xf32>
    %130 = vector.extract_strided_slice %12 {offsets = [0, 3, 0], sizes = [2, 1, 96], strides = [1, 1, 1]} : vector<2x8x96xf32> to vector<2x1x96xf32>
    %131 = vector.shape_cast %130 : vector<2x1x96xf32> to vector<2x96xf32>
    %cst_26 = arith.constant dense<0.000000e+00> : vector<2x96xf32>
    %132 = tpu.matmul %121, %0, %cst_26 {dimension_numbers = #tpu.dot_dimension_numbers<[1], [0], [0], [1], [0, 0, 1, 1], [], []>} : vector<2x32xf32>, vector<32x96xf32>, vector<2x96xf32> -> vector<2x96xf32>
    %133 = vector.extract_strided_slice %131 {offsets = [0, 0], sizes = [2, 64], strides = [1, 1]} : vector<2x96xf32> to vector<2x64xf32>
    %134 = vector.extract_strided_slice %132 {offsets = [0, 0], sizes = [2, 64], strides = [1, 1]} : vector<2x96xf32> to vector<2x64xf32>
    %135 = arith.addf %133, %134 : vector<2x64xf32>
    %136 = arith.negf %135 : vector<2x64xf32>
    %137 = math.exp %136 : vector<2x64xf32>
    %cst_27 = arith.constant 1.000000e+00 : f32
    %138 = vector.broadcast %cst_27 : f32 to vector<2x64xf32>
    %139 = arith.addf %138, %137 : vector<2x64xf32>
    %140 = arith.divf %138, %139 : vector<2x64xf32>
    %141 = vector.extract_strided_slice %140 {offsets = [0, 0], sizes = [2, 32], strides = [1, 1]} : vector<2x64xf32> to vector<2x32xf32>
    %142 = vector.extract_strided_slice %140 {offsets = [0, 32], sizes = [2, 32], strides = [1, 1]} : vector<2x64xf32> to vector<2x32xf32>
    %143 = vector.extract_strided_slice %131 {offsets = [0, 64], sizes = [2, 32], strides = [1, 1]} : vector<2x96xf32> to vector<2x32xf32>
    %144 = vector.extract_strided_slice %132 {offsets = [0, 64], sizes = [2, 32], strides = [1, 1]} : vector<2x96xf32> to vector<2x32xf32>
    %145 = arith.addf %144, %3 : vector<2x32xf32>
    %146 = arith.mulf %141, %145 : vector<2x32xf32>
    %147 = arith.addf %143, %146 : vector<2x32xf32>
    %148 = math.tanh %147 : vector<2x32xf32>
    %cst_28 = arith.constant 1.000000e+00 : f32
    %149 = vector.broadcast %cst_28 : f32 to vector<2x32xf32>
    %150 = arith.subf %149, %142 : vector<2x32xf32>
    %151 = arith.mulf %150, %148 : vector<2x32xf32>
    %152 = arith.mulf %142, %121 : vector<2x32xf32>
    %153 = arith.addf %151, %152 : vector<2x32xf32>
    %c3_i32 = arith.constant 3 : i32
    %154 = vector.broadcast %c3_i32 : i32 to vector<2x1xi32>
    %155 = arith.cmpi sgt, %4, %154 : vector<2x1xi32>
    %156 = vector.shape_cast %155 : vector<2x1xi1> to vector<2x1xi1>
    %157 = vector.broadcast %156 : vector<2x1xi1> to vector<2x32xi1>
    %158 = arith.select %157, %153, %121 : vector<2x32xi1>, vector<2x32xf32>
    %c3_i32_29 = arith.constant 3 : i32
    %159 = vector.broadcast %c3_i32_29 : i32 to vector<2x8x1xi32>
    %160 = arith.cmpi eq, %13, %159 : vector<2x8x1xi32>
    %161 = vector.shape_cast %153 : vector<2x32xf32> to vector<2x1x32xf32>
    %162 = vector.shape_cast %160 : vector<2x8x1xi1> to vector<2x8x1xi1>
    %163 = vector.broadcast %162 : vector<2x8x1xi1> to vector<2x8x32xi1>
    %164 = vector.shape_cast %161 : vector<2x1x32xf32> to vector<2x1x32xf32>
    %165 = vector.broadcast %164 : vector<2x1x32xf32> to vector<2x8x32xf32>
    %166 = arith.select %163, %165, %129 : vector<2x8x32xi1>, vector<2x8x32xf32>
    %167 = vector.extract_strided_slice %12 {offsets = [0, 4, 0], sizes = [2, 1, 96], strides = [1, 1, 1]} : vector<2x8x96xf32> to vector<2x1x96xf32>
    %168 = vector.shape_cast %167 : vector<2x1x96xf32> to vector<2x96xf32>
    %cst_30 = arith.constant dense<0.000000e+00> : vector<2x96xf32>
    %169 = tpu.matmul %158, %0, %cst_30 {dimension_numbers = #tpu.dot_dimension_numbers<[1], [0], [0], [1], [0, 0, 1, 1], [], []>} : vector<2x32xf32>, vector<32x96xf32>, vector<2x96xf32> -> vector<2x96xf32>
    %170 = vector.extract_strided_slice %168 {offsets = [0, 0], sizes = [2, 64], strides = [1, 1]} : vector<2x96xf32> to vector<2x64xf32>
    %171 = vector.extract_strided_slice %169 {offsets = [0, 0], sizes = [2, 64], strides = [1, 1]} : vector<2x96xf32> to vector<2x64xf32>
    %172 = arith.addf %170, %171 : vector<2x64xf32>
    %173 = arith.negf %172 : vector<2x64xf32>
    %174 = math.exp %173 : vector<2x64xf32>
    %cst_31 = arith.constant 1.000000e+00 : f32
    %175 = vector.broadcast %cst_31 : f32 to vector<2x64xf32>
    %176 = arith.addf %175, %174 : vector<2x64xf32>
    %177 = arith.divf %175, %176 : vector<2x64xf32>
    %178 = vector.extract_strided_slice %177 {offsets = [0, 0], sizes = [2, 32], strides = [1, 1]} : vector<2x64xf32> to vector<2x32xf32>
    %179 = vector.extract_strided_slice %177 {offsets = [0, 32], sizes = [2, 32], strides = [1, 1]} : vector<2x64xf32> to vector<2x32xf32>
    %180 = vector.extract_strided_slice %168 {offsets = [0, 64], sizes = [2, 32], strides = [1, 1]} : vector<2x96xf32> to vector<2x32xf32>
    %181 = vector.extract_strided_slice %169 {offsets = [0, 64], sizes = [2, 32], strides = [1, 1]} : vector<2x96xf32> to vector<2x32xf32>
    %182 = arith.addf %181, %3 : vector<2x32xf32>
    %183 = arith.mulf %178, %182 : vector<2x32xf32>
    %184 = arith.addf %180, %183 : vector<2x32xf32>
    %185 = math.tanh %184 : vector<2x32xf32>
    %cst_32 = arith.constant 1.000000e+00 : f32
    %186 = vector.broadcast %cst_32 : f32 to vector<2x32xf32>
    %187 = arith.subf %186, %179 : vector<2x32xf32>
    %188 = arith.mulf %187, %185 : vector<2x32xf32>
    %189 = arith.mulf %179, %158 : vector<2x32xf32>
    %190 = arith.addf %188, %189 : vector<2x32xf32>
    %c4_i32 = arith.constant 4 : i32
    %191 = vector.broadcast %c4_i32 : i32 to vector<2x1xi32>
    %192 = arith.cmpi sgt, %4, %191 : vector<2x1xi32>
    %193 = vector.shape_cast %192 : vector<2x1xi1> to vector<2x1xi1>
    %194 = vector.broadcast %193 : vector<2x1xi1> to vector<2x32xi1>
    %195 = arith.select %194, %190, %158 : vector<2x32xi1>, vector<2x32xf32>
    %c4_i32_33 = arith.constant 4 : i32
    %196 = vector.broadcast %c4_i32_33 : i32 to vector<2x8x1xi32>
    %197 = arith.cmpi eq, %13, %196 : vector<2x8x1xi32>
    %198 = vector.shape_cast %190 : vector<2x32xf32> to vector<2x1x32xf32>
    %199 = vector.shape_cast %197 : vector<2x8x1xi1> to vector<2x8x1xi1>
    %200 = vector.broadcast %199 : vector<2x8x1xi1> to vector<2x8x32xi1>
    %201 = vector.shape_cast %198 : vector<2x1x32xf32> to vector<2x1x32xf32>
    %202 = vector.broadcast %201 : vector<2x1x32xf32> to vector<2x8x32xf32>
    %203 = arith.select %200, %202, %166 : vector<2x8x32xi1>, vector<2x8x32xf32>
    %204 = vector.extract_strided_slice %12 {offsets = [0, 5, 0], sizes = [2, 1, 96], strides = [1, 1, 1]} : vector<2x8x96xf32> to vector<2x1x96xf32>
    %205 = vector.shape_cast %204 : vector<2x1x96xf32> to vector<2x96xf32>
    %cst_34 = arith.constant dense<0.000000e+00> : vector<2x96xf32>
    %206 = tpu.matmul %195, %0, %cst_34 {dimension_numbers = #tpu.dot_dimension_numbers<[1], [0], [0], [1], [0, 0, 1, 1], [], []>} : vector<2x32xf32>, vector<32x96xf32>, vector<2x96xf32> -> vector<2x96xf32>
    %207 = vector.extract_strided_slice %205 {offsets = [0, 0], sizes = [2, 64], strides = [1, 1]} : vector<2x96xf32> to vector<2x64xf32>
    %208 = vector.extract_strided_slice %206 {offsets = [0, 0], sizes = [2, 64], strides = [1, 1]} : vector<2x96xf32> to vector<2x64xf32>
    %209 = arith.addf %207, %208 : vector<2x64xf32>
    %210 = arith.negf %209 : vector<2x64xf32>
    %211 = math.exp %210 : vector<2x64xf32>
    %cst_35 = arith.constant 1.000000e+00 : f32
    %212 = vector.broadcast %cst_35 : f32 to vector<2x64xf32>
    %213 = arith.addf %212, %211 : vector<2x64xf32>
    %214 = arith.divf %212, %213 : vector<2x64xf32>
    %215 = vector.extract_strided_slice %214 {offsets = [0, 0], sizes = [2, 32], strides = [1, 1]} : vector<2x64xf32> to vector<2x32xf32>
    %216 = vector.extract_strided_slice %214 {offsets = [0, 32], sizes = [2, 32], strides = [1, 1]} : vector<2x64xf32> to vector<2x32xf32>
    %217 = vector.extract_strided_slice %205 {offsets = [0, 64], sizes = [2, 32], strides = [1, 1]} : vector<2x96xf32> to vector<2x32xf32>
    %218 = vector.extract_strided_slice %206 {offsets = [0, 64], sizes = [2, 32], strides = [1, 1]} : vector<2x96xf32> to vector<2x32xf32>
    %219 = arith.addf %218, %3 : vector<2x32xf32>
    %220 = arith.mulf %215, %219 : vector<2x32xf32>
    %221 = arith.addf %217, %220 : vector<2x32xf32>
    %222 = math.tanh %221 : vector<2x32xf32>
    %cst_36 = arith.constant 1.000000e+00 : f32
    %223 = vector.broadcast %cst_36 : f32 to vector<2x32xf32>
    %224 = arith.subf %223, %216 : vector<2x32xf32>
    %225 = arith.mulf %224, %222 : vector<2x32xf32>
    %226 = arith.mulf %216, %195 : vector<2x32xf32>
    %227 = arith.addf %225, %226 : vector<2x32xf32>
    %c5_i32 = arith.constant 5 : i32
    %228 = vector.broadcast %c5_i32 : i32 to vector<2x1xi32>
    %229 = arith.cmpi sgt, %4, %228 : vector<2x1xi32>
    %230 = vector.shape_cast %229 : vector<2x1xi1> to vector<2x1xi1>
    %231 = vector.broadcast %230 : vector<2x1xi1> to vector<2x32xi1>
    %232 = arith.select %231, %227, %195 : vector<2x32xi1>, vector<2x32xf32>
    %c5_i32_37 = arith.constant 5 : i32
    %233 = vector.broadcast %c5_i32_37 : i32 to vector<2x8x1xi32>
    %234 = arith.cmpi eq, %13, %233 : vector<2x8x1xi32>
    %235 = vector.shape_cast %227 : vector<2x32xf32> to vector<2x1x32xf32>
    %236 = vector.shape_cast %234 : vector<2x8x1xi1> to vector<2x8x1xi1>
    %237 = vector.broadcast %236 : vector<2x8x1xi1> to vector<2x8x32xi1>
    %238 = vector.shape_cast %235 : vector<2x1x32xf32> to vector<2x1x32xf32>
    %239 = vector.broadcast %238 : vector<2x1x32xf32> to vector<2x8x32xf32>
    %240 = arith.select %237, %239, %203 : vector<2x8x32xi1>, vector<2x8x32xf32>
    %241 = vector.extract_strided_slice %12 {offsets = [0, 6, 0], sizes = [2, 1, 96], strides = [1, 1, 1]} : vector<2x8x96xf32> to vector<2x1x96xf32>
    %242 = vector.shape_cast %241 : vector<2x1x96xf32> to vector<2x96xf32>
    %cst_38 = arith.constant dense<0.000000e+00> : vector<2x96xf32>
    %243 = tpu.matmul %232, %0, %cst_38 {dimension_numbers = #tpu.dot_dimension_numbers<[1], [0], [0], [1], [0, 0, 1, 1], [], []>} : vector<2x32xf32>, vector<32x96xf32>, vector<2x96xf32> -> vector<2x96xf32>
    %244 = vector.extract_strided_slice %242 {offsets = [0, 0], sizes = [2, 64], strides = [1, 1]} : vector<2x96xf32> to vector<2x64xf32>
    %245 = vector.extract_strided_slice %243 {offsets = [0, 0], sizes = [2, 64], strides = [1, 1]} : vector<2x96xf32> to vector<2x64xf32>
    %246 = arith.addf %244, %245 : vector<2x64xf32>
    %247 = arith.negf %246 : vector<2x64xf32>
    %248 = math.exp %247 : vector<2x64xf32>
    %cst_39 = arith.constant 1.000000e+00 : f32
    %249 = vector.broadcast %cst_39 : f32 to vector<2x64xf32>
    %250 = arith.addf %249, %248 : vector<2x64xf32>
    %251 = arith.divf %249, %250 : vector<2x64xf32>
    %252 = vector.extract_strided_slice %251 {offsets = [0, 0], sizes = [2, 32], strides = [1, 1]} : vector<2x64xf32> to vector<2x32xf32>
    %253 = vector.extract_strided_slice %251 {offsets = [0, 32], sizes = [2, 32], strides = [1, 1]} : vector<2x64xf32> to vector<2x32xf32>
    %254 = vector.extract_strided_slice %242 {offsets = [0, 64], sizes = [2, 32], strides = [1, 1]} : vector<2x96xf32> to vector<2x32xf32>
    %255 = vector.extract_strided_slice %243 {offsets = [0, 64], sizes = [2, 32], strides = [1, 1]} : vector<2x96xf32> to vector<2x32xf32>
    %256 = arith.addf %255, %3 : vector<2x32xf32>
    %257 = arith.mulf %252, %256 : vector<2x32xf32>
    %258 = arith.addf %254, %257 : vector<2x32xf32>
    %259 = math.tanh %258 : vector<2x32xf32>
    %cst_40 = arith.constant 1.000000e+00 : f32
    %260 = vector.broadcast %cst_40 : f32 to vector<2x32xf32>
    %261 = arith.subf %260, %253 : vector<2x32xf32>
    %262 = arith.mulf %261, %259 : vector<2x32xf32>
    %263 = arith.mulf %253, %232 : vector<2x32xf32>
    %264 = arith.addf %262, %263 : vector<2x32xf32>
    %c6_i32 = arith.constant 6 : i32
    %265 = vector.broadcast %c6_i32 : i32 to vector<2x1xi32>
    %266 = arith.cmpi sgt, %4, %265 : vector<2x1xi32>
    %267 = vector.shape_cast %266 : vector<2x1xi1> to vector<2x1xi1>
    %268 = vector.broadcast %267 : vector<2x1xi1> to vector<2x32xi1>
    %269 = arith.select %268, %264, %232 : vector<2x32xi1>, vector<2x32xf32>
    %c6_i32_41 = arith.constant 6 : i32
    %270 = vector.broadcast %c6_i32_41 : i32 to vector<2x8x1xi32>
    %271 = arith.cmpi eq, %13, %270 : vector<2x8x1xi32>
    %272 = vector.shape_cast %264 : vector<2x32xf32> to vector<2x1x32xf32>
    %273 = vector.shape_cast %271 : vector<2x8x1xi1> to vector<2x8x1xi1>
    %274 = vector.broadcast %273 : vector<2x8x1xi1> to vector<2x8x32xi1>
    %275 = vector.shape_cast %272 : vector<2x1x32xf32> to vector<2x1x32xf32>
    %276 = vector.broadcast %275 : vector<2x1x32xf32> to vector<2x8x32xf32>
    %277 = arith.select %274, %276, %240 : vector<2x8x32xi1>, vector<2x8x32xf32>
    %278 = vector.extract_strided_slice %12 {offsets = [0, 7, 0], sizes = [2, 1, 96], strides = [1, 1, 1]} : vector<2x8x96xf32> to vector<2x1x96xf32>
    %279 = vector.shape_cast %278 : vector<2x1x96xf32> to vector<2x96xf32>
    %cst_42 = arith.constant dense<0.000000e+00> : vector<2x96xf32>
    %280 = tpu.matmul %269, %0, %cst_42 {dimension_numbers = #tpu.dot_dimension_numbers<[1], [0], [0], [1], [0, 0, 1, 1], [], []>} : vector<2x32xf32>, vector<32x96xf32>, vector<2x96xf32> -> vector<2x96xf32>
    %281 = vector.extract_strided_slice %279 {offsets = [0, 0], sizes = [2, 64], strides = [1, 1]} : vector<2x96xf32> to vector<2x64xf32>
    %282 = vector.extract_strided_slice %280 {offsets = [0, 0], sizes = [2, 64], strides = [1, 1]} : vector<2x96xf32> to vector<2x64xf32>
    %283 = arith.addf %281, %282 : vector<2x64xf32>
    %284 = arith.negf %283 : vector<2x64xf32>
    %285 = math.exp %284 : vector<2x64xf32>
    %cst_43 = arith.constant 1.000000e+00 : f32
    %286 = vector.broadcast %cst_43 : f32 to vector<2x64xf32>
    %287 = arith.addf %286, %285 : vector<2x64xf32>
    %288 = arith.divf %286, %287 : vector<2x64xf32>
    %289 = vector.extract_strided_slice %288 {offsets = [0, 0], sizes = [2, 32], strides = [1, 1]} : vector<2x64xf32> to vector<2x32xf32>
    %290 = vector.extract_strided_slice %288 {offsets = [0, 32], sizes = [2, 32], strides = [1, 1]} : vector<2x64xf32> to vector<2x32xf32>
    %291 = vector.extract_strided_slice %279 {offsets = [0, 64], sizes = [2, 32], strides = [1, 1]} : vector<2x96xf32> to vector<2x32xf32>
    %292 = vector.extract_strided_slice %280 {offsets = [0, 64], sizes = [2, 32], strides = [1, 1]} : vector<2x96xf32> to vector<2x32xf32>
    %293 = arith.addf %292, %3 : vector<2x32xf32>
    %294 = arith.mulf %289, %293 : vector<2x32xf32>
    %295 = arith.addf %291, %294 : vector<2x32xf32>
    %296 = math.tanh %295 : vector<2x32xf32>
    %cst_44 = arith.constant 1.000000e+00 : f32
    %297 = vector.broadcast %cst_44 : f32 to vector<2x32xf32>
    %298 = arith.subf %297, %290 : vector<2x32xf32>
    %299 = arith.mulf %298, %296 : vector<2x32xf32>
    %300 = arith.mulf %290, %269 : vector<2x32xf32>
    %301 = arith.addf %299, %300 : vector<2x32xf32>
    %c7_i32 = arith.constant 7 : i32
    %302 = vector.broadcast %c7_i32 : i32 to vector<2x8x1xi32>
    %303 = arith.cmpi eq, %13, %302 : vector<2x8x1xi32>
    %304 = vector.shape_cast %301 : vector<2x32xf32> to vector<2x1x32xf32>
    %305 = vector.shape_cast %303 : vector<2x8x1xi1> to vector<2x8x1xi1>
    %306 = vector.broadcast %305 : vector<2x8x1xi1> to vector<2x8x32xi1>
    %307 = vector.shape_cast %304 : vector<2x1x32xf32> to vector<2x1x32xf32>
    %308 = vector.broadcast %307 : vector<2x1x32xf32> to vector<2x8x32xf32>
    %309 = arith.select %306, %308, %277 : vector<2x8x32xi1>, vector<2x8x32xf32>
    %cst_45 = arith.constant 0.000000e+00 : f32
    %310 = vector.shape_cast %16 : vector<2x8x1xi1> to vector<2x8x1xi1>
    %311 = vector.broadcast %310 : vector<2x8x1xi1> to vector<2x8x32xi1>
    %312 = vector.broadcast %cst_45 : f32 to vector<2x8x32xf32>
    %313 = arith.select %311, %309, %312 : vector<2x8x32xi1>, vector<2x8x32xf32>
    %314 = vector.shape_cast %313 : vector<2x8x32xf32> to vector<16x32xf32>
    %c0_46 = arith.constant 0 : index
    %c0_47 = arith.constant 0 : index
    %315 = vector.load %arg7[%c0_46, %c0_47] : memref<32x2xf32, #tpu.memory_space<vmem>>, vector<32x2xf32>
    %cst_48 = arith.constant dense<0.000000e+00> : vector<16x2xf32>
    %316 = tpu.matmul %314, %315, %cst_48 {dimension_numbers = #tpu.dot_dimension_numbers<[1], [0], [0], [1], [0, 0, 1, 1], [], []>} : vector<16x32xf32>, vector<32x2xf32>, vector<16x2xf32> -> vector<16x2xf32>
    %c0_49 = arith.constant 0 : index
    %c0_50 = arith.constant 0 : index
    %317 = vector.load %arg8[%c0_49, %c0_50] : memref<1x2xf32, #tpu.memory_space<vmem>>, vector<1x2xf32>
    %318 = vector.broadcast %317 : vector<1x2xf32> to vector<16x2xf32>
    %319 = arith.addf %316, %318 : vector<16x2xf32>
    %320 = vector.shape_cast %319 : vector<16x2xf32> to vector<2x8x2xf32>
    %c0_51 = arith.constant 0 : index
    %c0_52 = arith.constant 0 : index
    %c0_53 = arith.constant 0 : index
    %321 = vector.load %arg9[%c0_51, %c0_52, %c0_53] : memref<2x8x2xf32, #tpu.memory_space<vmem>>, vector<2x8x2xf32>
    tpu.vector_store %arg9[%c0_51, %c0_52, %c0_53], %320 {strides = array<i32>} : memref<2x8x2xf32, #tpu.memory_space<vmem>>, vector<2x8x2xf32>,
    return
  }
  func.func @transform_0(%arg0: i32) -> (i32, i32, i32) {
    %c0_i32 = arith.constant 0 : i32
    %c0_i32_0 = arith.constant 0 : i32
    %c0_i32_1 = arith.constant 0 : i32
    return %arg0, %c0_i32, %c0_i32_0 : i32, i32, i32
  }
  func.func @transform_1(%arg0: i32) -> (i32, i32) {
    %c0_i32 = arith.constant 0 : i32
    %c0_i32_0 = arith.constant 0 : i32
    return %arg0, %c0_i32 : i32, i32
  }
  func.func @transform_2(%arg0: i32) -> (i32, i32) {
    %c0_i32 = arith.constant 0 : i32
    %c0_i32_0 = arith.constant 0 : i32
    %c0_i32_1 = arith.constant 0 : i32
    return %c0_i32, %c0_i32_0 : i32, i32
  }
  func.func @transform_3(%arg0: i32) -> (i32, i32) {
    %c0_i32 = arith.constant 0 : i32
    %c0_i32_0 = arith.constant 0 : i32
    %c0_i32_1 = arith.constant 0 : i32
    return %c0_i32, %c0_i32_0 : i32, i32
  }
  func.func @transform_4(%arg0: i32) -> (i32, i32) {
    %c0_i32 = arith.constant 0 : i32
    %c0_i32_0 = arith.constant 0 : i32
    %c0_i32_1 = arith.constant 0 : i32
    return %c0_i32, %c0_i32_0 : i32, i32
  }
  func.func @transform_5(%arg0: i32) -> (i32, i32) {
    %c0_i32 = arith.constant 0 : i32
    %c0_i32_0 = arith.constant 0 : i32
    %c0_i32_1 = arith.constant 0 : i32
    return %c0_i32, %c0_i32_0 : i32, i32
  }
  func.func @transform_6(%arg0: i32) -> (i32, i32) {
    %c0_i32 = arith.constant 0 : i32
    %c0_i32_0 = arith.constant 0 : i32
    %c0_i32_1 = arith.constant 0 : i32
    return %c0_i32, %c0_i32_0 : i32, i32
  }
  func.func @transform_7(%arg0: i32) -> (i32, i32) {
    %c0_i32 = arith.constant 0 : i32
    %c0_i32_0 = arith.constant 0 : i32
    %c0_i32_1 = arith.constant 0 : i32
    return %c0_i32, %c0_i32_0 : i32, i32
  }
  func.func @transform_8(%arg0: i32) -> (i32, i32, i32) {
    %c0_i32 = arith.constant 0 : i32
    %c0_i32_0 = arith.constant 0 : i32
    %c0_i32_1 = arith.constant 0 : i32
    return %arg0, %c0_i32, %c0_i32_0 : i32, i32, i32
  }
}

</mosaic_0001>

<bundles_post_ra>
// kernel: tpu_custom_call.1
= control target key start
LH: loop header
LB: loop body
LE: loop exit
PB: predicated region body
PF: predicated region fallthrough
CT: control target
= control target key end

     0   :  { %vm57_vm0 = vcmask 1045504   ;;  %v1895_v0 = vmov 0.0   ;;  %vm50_vm1 = vcmask 48128   ;;  %vm1896_vm2 = vmmov 0   ;;  %s1897_s19 = smov 64   ;;  %s1899_s21 = smov 96   ;;  %s2353_s4 = inlined_call_operand.vmem [shape: f32[32,96], index: 4, kind: input, shape index: {}]   ;;  %s2354_s2 = inlined_call_operand.vmem [shape: f32[6,96], index: 2, kind: input, shape index: {}]   ;;  %s2355_s0 = inlined_call_operand.vmem [shape: f32[2,8,6], index: 0, kind: input, shape index: {}]   ;;  %s2356_s5 = inlined_call_operand.vmem [shape: f32[1,32], index: 5, kind: input, shape index: {}]   ;;  %s2357_s3 = inlined_call_operand.vmem [shape: f32[1,96], index: 3, kind: input, shape index: {}]   ;;  %s2358_s1 = inlined_call_operand.vmem [shape: s32[2,1], index: 1, kind: input, shape index: {}]   ;;  %s2359_s6 = inlined_call_operand.vmem [shape: f32[32,2], index: 6, kind: input, shape index: {}]   ;;  %s2360_s7 = inlined_call_operand.vmem [shape: f32[1,2], index: 7, kind: input, shape index: {}]   ;;  %s2361_s8 = inlined_call_operand.vmem [shape: f32[2,8,2], index: 8, kind: output, shape index: {}]  }
   0x1   :  { %1689 = vmatprep.subr.mxu1 %v1895_v0  ;;  %v1951_v1 = vld [vmem:[%s2353_s4 + $0x18] sm:$0xff]  ;;  %v42_v2 = vld [vmem:[%s2354_s2] sm:$0x3f]  ;;  %1697 = vmatprep.mubr.msk.f32.mxu1 %vm1896_vm2, %v1895_v0  ;;  %v41_v4 = vld [vmem:[%s2355_s0 + $0x8] sm:$0xff]  ;;  %v1898_v34 = vmov 0   ;;  %vm313_vm4 = vcmask 1041409  }
   0x2   :  { %v40_v3 = vld [vmem:[%s2355_s0] sm:$0xff]  ;;  %1690 = vmatpush3.msra.mxu1 %v1951_v1  ;;  %1684 = vmatprep.subr.msk.mxu0 %vm57_vm0, %v42_v2  ;;  %v1969_v5 = vld [vmem:[%s2353_s4 + $0x10] sm:$0xff]  ;;  %v1976_v6 = vld [vmem:[%s2353_s4 + $0x8] sm:$0xff]  ;;  %vm170_vm6 = vcmask 261120   ;;  %s1900_s22 = smov 32  }
   0x3   :  { %1691 = vmatprep.subr.mxu1 %v1895_v0  ;;  %1685 = vmatpush3.msk.msra.mxu0 %vm57_vm0, %v42_v2  ;;  %v1604_v7 = vld [vmem:[%s2356_s5] ss:$0 sm:$0xff] }
   0x4   :  { %1686 = vmatprep.mubr.msk.f32.mxu0 %vm50_vm1, %v40_v3  ;;  %1692 = vmatpush3.msra.mxu1 %v1969_v5  ;;  %v1986_v8 = vld [vmem:[%s2353_s4] sm:$0xff] }
   0x5   :  { %1687 = vmatmul.mubr.msk.f32.vlgmr.msra.gmra.mxu0 %vm50_vm1, %v41_v4  ;;  %1693 = vmatprep.subr.mxu1 %v1895_v0  ;;  %v1605_v15 = vld [vmem:[%s2357_s3] ss:$0 sm:$0xff] }
   0x6   :  { %1694 = vmatpush3.msra.mxu1 %v1976_v6  ;;  %262 = vrot.lane.b32.xlu0 %v1604_v7, %s1897_s19  ;;  %v2038_v39 = vld [vmem:[%s2358_s1] sm:$0x3] }
   0x7   :  { %1695 = vmatprep.subr.mxu1 %v1895_v0  ;;  %1700 = vmatprep.subr.mxu0 %v1895_v0  ;;  %vm304_vm3 = vcmp.gt.s32.totalorder %v2038_v39, 0  ;;  %vm469_vm7 = vcmp.gt.s32.totalorder %v2038_v39, 1  ;;  %vm636_vm11 = vcmp.gt.s32.totalorder %v2038_v39, 2  ;;  %vm804_vm14 = vcmp.gt.s32.totalorder %v2038_v39, 3 }
   0x8   :  { %1696 = vmatpush3.msra.mxu1 %v1986_v8  ;;  %1701 = vmatpush3.msra.mxu0 %v1951_v1  ;;  %v305_v42 = vsel %vm304_vm3, 1, %v1898_v34  ;;  %vm972_vm1 = vcmp.gt.s32.totalorder %v2038_v39, 4 }
   0x9   :  { %1698 = vmatmul.mubr.f32.vlgmr.msra.gmra.mxu1 %v1895_v0  ;;  %1702 = vmatprep.subr.mxu0 %v1895_v0 }
   0xa   :  { %1703 = vmatpush3.msra.mxu0 %v1969_v5  ;;  %1708 = vmatprep.mubr.msk.f32.mxu0 %vm1896_vm2, %v1895_v0 }
   0xb   :  { %1704 = vmatprep.subr.mxu0 %v1895_v0  ;;  %1711 = vmatprep.subr.mxu1 %v1895_v0 }
   0xc   :  { %1705 = vmatpush3.msra.mxu0 %v1976_v6  ;;  %1712 = vmatpush3.msra.mxu1 %v1951_v1 }
   0xd   :  { %1706 = vmatprep.subr.mxu0 %v1895_v0  ;;  %1713 = vmatprep.subr.mxu1 %v1895_v0 }
   0xe   :  { %1707 = vmatpush3.msra.mxu0 %v1986_v8  ;;  %1714 = vmatpush3.msra.mxu1 %v1969_v5 }
   0xf   :  { %1715 = vmatprep.subr.mxu1 %v1895_v0  ;;  %1719 = vmatprep.mubr.msk.f32.mxu1 %vm1896_vm2, %v1895_v0 }
  0x10   :  { %1716 = vmatpush3.msra.mxu1 %v1976_v6  ;;  %1722 = vmatprep.subr.mxu0 %v1895_v0 }
  0x11   :  { %1717 = vmatprep.subr.mxu1 %v1895_v0  ;;  %1795 = vset.pattern.permute.xlu1 %v1898_v34 }
  0x12   :  { %1718 = vmatpush3.msra.mxu1 %v1986_v8  ;;  %1796 = vset.pattern.permute.xlu0 %v1898_v34 }
  0x13   :  { %1733 = vmatprep.subr.mxu1 %v1895_v0 }
  0x78   :  { %v2015_v9 = vpop.permute.xlu0 %262 }
  0xc5   :  { %v1688_v14 = vpop.f32.mrf.mxu0 }
  0xc6   :  { %v2025_v18 = vadd.f32 %v1688_v14, %v1605_v15 }
  0xc7   :  { %v127_v16 = vpop.f32.mrf.mxu0 }
  0xc8   :  { %v2023_v17 = vadd.f32 %v1605_v15, %v127_v16 }
  0xc9   :  { %v240_v10 = vpop.f32.mrf.mxu1 }
  0xca   :  { %v265_v11 = vadd.f32 %v2015_v9, %v240_v10  ;;  %v245_v19 = vrot.slane %v240_v10, 1  ;;  %v248_v20 = vadd.f32 %v240_v10, %v2023_v17 }
  0xcb   :  { %v1699_v12 = vpop.f32.mrf.mxu1 }
  0xcc   :  { %268 = vrot.lane.b32.xlu1 %v265_v11, %s1897_s19  ;;  %v267_v13 = vrot.slane %v265_v11, 1  ;;  %v249_v21 = vadd.f32 %v245_v19, %v2025_v18  ;;  %v1609_v22 = vmul.f32 -1.442695, %v248_v20 }
  0xce   :  { %270 = vrot.lane.b32.xlu0 %v267_v13, %s1897_s19  ;;  %v1610_v23 = vmul.f32 -1.442695, %v249_v21  ;;  %1797 = vpow2.f32 %v1609_v22 }
  0xd0   :  { %1799 = vpow2.f32 %v1610_v23 }
  0xdb   :  { %v1798_v24 = vpop.eup %1797 }
  0xdc   :  { %v256_v26 = vadd.f32 1.0, %v1798_v24 }
  0xdd   :  { %v1800_v25 = vpop.eup %1799 }
  0xde   :  { %v257_v27 = vadd.f32 1.0, %v1800_v25  ;;  %1801 = vrcp.f32 %v256_v26 }
  0xe0   :  { %1803 = vrcp.f32 %v257_v27 }
  0xeb   :  { %v1802_v28 = vpop.eup %1801 }
  0xec   :  { %v288_v44 = vsub.f32 1.0, %v1802_v28  ;;  %v300_v50 = vmul.f32 0.0, %v1802_v28 }
  0xed   :  { %v1804_v31 = vpop.eup %1803 }
  0xee   :  { %v289_v45 = vsub.f32 1.0, %v1804_v31  ;;  %v301_v48 = vmul.f32 0.0, %v1804_v31 }
 0x13e   :  { %v269_v29 = vpop.permute.xlu1 %268 }
 0x13f   :  { %v274_v30 = vmul.f32 %v1802_v28, %v269_v29  ;;  %v470_v28 = vsel %vm469_vm7, 1, %v1898_v34  ;;  %v136_v29 = vlaneseq }
 0x140   :  { %v271_v32 = vpop.permute.xlu0 %270 }
 0x141   :  { %v275_v33 = vmul.f32 %v1804_v31, %v271_v32  ;;  %278 = vrot.lane.b32.xlu0 %v274_v30, %s1897_s19  ;;  %v2083_v30 = vshrl.u32 %v136_v29, 7 }
 0x143   :  { %280 = vrot.lane.b32.xlu1 %v275_v33, %s1897_s19  ;;  %v2086_v32 = vsub.s32 0, %v2083_v30  ;;  %vm319_vm8 = vcmp.eq.s32.totalorder %v2083_v30, 0  ;;  %vm483_vm9 = vcmp.eq.s32.totalorder %v2083_v30, 1  ;;  %vm651_vm12 = vcmp.eq.s32.totalorder %v2083_v30, 2 }
 0x144   :  { %vm819_vm15 = vcmp.eq.s32.totalorder %v2083_v30, 3  ;;  %vm987_vm3 = vcmp.eq.s32.totalorder %v2083_v30, 4  ;;  %vm1155_vm7 = vcmp.eq.s32.totalorder %v2083_v30, 5 }
 0x1b3   :  { %v279_v35 = vpop.permute.xlu0 %278 }
 0x1b4   :  { %v284_v36 = vadd.f32 %v279_v35, %v2023_v17 }
 0x1b5   :  { %v281_v37 = vpop.permute.xlu1 %280 }
 0x1b6   :  { %1805 = vtanh.f32 %v284_v36  ;;  %v285_v38 = vadd.f32 %v281_v37, %v2025_v18  ;;  %v488_v37 = vsub.s32 1, %v2083_v30 }
 0x1b8   :  { %1807 = vtanh.f32 %v285_v38 }
 0x1c3   :  { %v1806_v40 = vpop.eup %1805 }
 0x1c4   :  { %292 = vrot.lane.b32.xlu0 %v1806_v40, %s1899_s21 }
 0x1c5   :  { %v1808_v41 = vpop.eup %1807 }
 0x1c6   :  { %294 = vrot.lane.b32.xlu1 %v1808_v41, %s1899_s21 }
 0x1ca   :  { %307 = vperm.xlu1 %1795, %v305_v42  }
 0x236   :  { %v293_v43 = vpop.permute.xlu0 %292 }
 0x237   :  { %v298_v47 = vmul.f32 %v293_v43, %v288_v44 }
 0x238   :  { %v295_v46 = vpop.permute.xlu1 %294 }
 0x239   :  { %v299_v49 = vmul.f32 %v295_v46, %v289_v45  ;;  %v2046_v52 = vadd.f32 %v300_v50, %v298_v47 }
 0x23b   :  { %v2044_v51 = vadd.f32 %v301_v48, %v299_v49  ;;  %v325_v40 = vrot.slane %v2046_v52, %v2086_v32 }
 0x23d   :  { %v312_v53 = vrot.slane %v2044_v51, 7  ;;  %v330_v48 = vsel %vm319_vm8, %v325_v40, 0.0  ;;  %v329_v49 = vrot.slane %v2044_v51, %v2086_v32 }
 0x23f   :  { %v314_v54 = vsel %vm313_vm4, %v312_v53, %v2046_v52 }
 0x240   :  { %315 = vrot.lane.b32.xlu0 %v314_v54, %s1899_s21 }
 0x245   :  { %v308_v55 = vpop.permute.xlu1 %307 }
 0x246   :  { %vm309_vm5 = vcmp.eq.s32.totalorder %v308_v55, 1 }
 0x2b2   :  { %v316_v56 = vpop.permute.xlu0 %315 }
 0x2b3   :  { %v2052_v57 = vsel %vm309_vm5, %v316_v56, 0.0  ;;  %v331_v56 = vsel %vm319_vm8, %v329_v49, 0.0 }
 0x2b4   :  { %1709 = vmatmul.mubr.msk.f32.vlgmr.msra.gmra.mxu0 %vm170_vm6, %v2052_v57  ;;  %v458_v21 = vrot.slane %v2052_v57, 7 }
 0x2b5   :  { %1723 = vmatpush3.msra.mxu0 %v1951_v1  ;;  %1730 = vmatprep.mubr.msk.f32.mxu0 %vm1896_vm2, %v1895_v0 }
 0x2b6   :  { %1724 = vmatprep.subr.mxu0 %v1895_v0 }
 0x2b7   :  { %1725 = vmatpush3.msra.mxu0 %v1969_v5 }
 0x2b8   :  { %1726 = vmatprep.subr.mxu0 %v1895_v0 }
 0x2b9   :  { %1727 = vmatpush3.msra.mxu0 %v1976_v6 }
 0x2ba   :  { %1728 = vmatprep.subr.mxu0 %v1895_v0 }
 0x2bb   :  { %1729 = vmatpush3.msra.mxu0 %v1986_v8 }
 0x2bc   :  { %1744 = vmatprep.subr.mxu0 %v1895_v0 }
 0x374   :  { %v401_v58 = vpop.f32.mrf.mxu0 }
 0x375   :  { %v423_v59 = vadd.f32 %v401_v58, %v2015_v9  ;;  %v406_v62 = vrot.slane %v401_v58, 7  ;;  %v410_v63 = vadd.f32 %v401_v58, %v2025_v18 }
 0x376   :  { %v1710_v60 = vpop.f32.mrf.mxu0 }
 0x377   :  { %428 = vrot.lane.b32.xlu0 %v423_v59, %s1897_s19  ;;  %v425_v61 = vrot.slane %v423_v59, 7  ;;  %v409_v2 = vadd.f32 %v406_v62, %v2023_v17  ;;  %v1613_v3 = vmul.f32 -1.442695, %v410_v63 }
 0x379   :  { %426 = vrot.lane.b32.xlu1 %v425_v61, %s1897_s19  ;;  %v1612_v4 = vmul.f32 -1.442695, %v409_v2  ;;  %1809 = vpow2.f32 %v1613_v3 }
 0x37b   :  { %1811 = vpow2.f32 %v1612_v4 }
 0x386   :  { %v1810_v7 = vpop.eup %1809 }
 0x387   :  { %v418_v11 = vadd.f32 1.0, %v1810_v7 }
 0x388   :  { %v1812_v10 = vpop.eup %1811 }
 0x389   :  { %v417_v12 = vadd.f32 1.0, %v1812_v10  ;;  %1813 = vrcp.f32 %v418_v11 }
 0x38b   :  { %1815 = vrcp.f32 %v417_v12 }
 0x396   :  { %v1814_v13 = vpop.eup %1813 }
 0x397   :  { %v447_v43 = vsub.f32 1.0, %v1814_v13 }
 0x398   :  { %v1816_v16 = vpop.eup %1815 }
 0x399   :  { %v446_v33 = vsub.f32 1.0, %v1816_v16 }
 0x3e9   :  { %v429_v14 = vpop.permute.xlu0 %428 }
 0x3ea   :  { %v433_v15 = vmul.f32 %v1814_v13, %v429_v14 }
 0x3eb   :  { %v427_v19 = vpop.permute.xlu1 %426 }
 0x3ec   :  { %v432_v20 = vmul.f32 %v1816_v16, %v427_v19  ;;  %438 = vrot.lane.b32.xlu0 %v433_v15, %s1897_s19 }
 0x3ee   :  { %436 = vrot.lane.b32.xlu1 %v432_v20, %s1897_s19 }
 0x3f0   :  { %459 = vrot.lane.b32.xlu0 %v458_v21, %s1900_s22 }
 0x3f4   :  { %461 = vrot.lane.b32.xlu0 %v2052_v57, %s1900_s22 }
 0x45e   :  { %v439_v22 = vpop.permute.xlu0 %438 }
 0x45f   :  { %v443_v25 = vadd.f32 %v439_v22, %v2025_v18 }
 0x460   :  { %v437_v23 = vpop.permute.xlu1 %436 }
 0x461   :  { %v442_v24 = vadd.f32 %v437_v23, %v2023_v17 }
 0x462   :  { %v460_v31 = vpop.permute.xlu0 %459 }
 0x463   :  { %1817 = vtanh.f32 %v442_v24  ;;  %v465_v36 = vmul.f32 %v1816_v16, %v460_v31 }
 0x464   :  { %1819 = vtanh.f32 %v443_v25 }
 0x466   :  { %v462_v41 = vpop.permute.xlu0 %461 }
 0x467   :  { %v466_v45 = vmul.f32 %v1814_v13, %v462_v41 }
 0x470   :  { %v1818_v26 = vpop.eup %1817 }
 0x471   :  { %450 = vrot.lane.b32.xlu1 %v1818_v26, %s1899_s21  ;;  %v1820_v27 = vpop.eup %1819 }
 0x475   :  { %452 = vrot.lane.b32.xlu1 %v1820_v27, %s1899_s21 }
 0x479   :  { %472 = vperm.xlu1 %1795, %v470_v28  }
 0x4e3   :  { %v451_v35 = vpop.permute.xlu1 %450 }
 0x4e4   :  { %v456_v38 = vmul.f32 %v451_v35, %v446_v33 }
 0x4e6   :  { %v467_v42 = vadd.f32 %v465_v36, %v456_v38  ;;  %v637_v36 = vsel %vm636_vm11, 1, %v1898_v34 }
 0x4e7   :  { %v453_v44 = vpop.permute.xlu1 %452 }
 0x4e8   :  { %v489_v46 = vrot.slane %v467_v42, %v488_v37  ;;  %v457_v47 = vmul.f32 %v453_v44, %v447_v43  ;;  %v477_v50 = vrot.slane %v467_v42, 1  ;;  %v656_v44 = vsub.s32 2, %v2083_v30 }
 0x4ea   :  { %v2095_v53 = vsel %vm483_vm9, %v489_v46, %v330_v48  ;;  %v468_v54 = vadd.f32 %v466_v45, %v457_v47 }
 0x4ec   :  { %v493_v52 = vrot.slane %v468_v54, %v488_v37  ;;  %v478_v55 = vsel %vm313_vm4, %v468_v54, %v477_v50 }
 0x4ed   :  { %479 = vrot.lane.b32.xlu0 %v478_v55, %s1899_s21 }
 0x4ee   :  { %v2099_v58 = vsel %vm483_vm9, %v493_v52, %v331_v56  ;;  %vm1308_vm9 = vcmp.gt.s32.totalorder %v2038_v39, 6 }
 0x4f4   :  { %v473_v59 = vpop.permute.xlu1 %472 }
 0x4f5   :  { %vm474_vm10 = vcmp.eq.s32.totalorder %v473_v59, 1 }
 0x55f   :  { %v480_v60 = vpop.permute.xlu0 %479 }
 0x560   :  { %v2102_v61 = vsel %vm474_vm10, %v480_v60, %v2052_v57  ;;  %vm1323_vm10 = vcmp.eq.s32.totalorder %v2083_v30, 6 }
 0x561   :  { %1720 = vmatmul.mubr.msk.f32.vlgmr.msra.gmra.mxu1 %vm170_vm6, %v2102_v61  ;;  %v625_v33 = vrot.slane %v2102_v61, 7  ;;  %v624_v35 = vrot.slane %v2102_v61, 6 }
 0x562   :  { %1734 = vmatpush3.msra.mxu1 %v1951_v1  ;;  %1741 = vmatprep.mubr.msk.f32.mxu1 %vm1896_vm2, %v1895_v0 }
 0x563   :  { %1735 = vmatprep.subr.mxu1 %v1895_v0 }
 0x564   :  { %1736 = vmatpush3.msra.mxu1 %v1969_v5 }
 0x565   :  { %1737 = vmatprep.subr.mxu1 %v1895_v0 }
 0x566   :  { %1738 = vmatpush3.msra.mxu1 %v1976_v6 }
 0x567   :  { %1739 = vmatprep.subr.mxu1 %v1895_v0 }
 0x568   :  { %1740 = vmatpush3.msra.mxu1 %v1986_v8 }
 0x569   :  { %1755 = vmatprep.subr.mxu1 %v1895_v0 }
 0x621   :  { %v565_v51 = vpop.f32.mrf.mxu1 }
 0x622   :  { %v588_v57 = vadd.f32 %v565_v51, %v2015_v9  ;;  %v570_v3 = vrot.slane %v565_v51, 6  ;;  %v571_v4 = vrot.slane %v565_v51, 7 }
 0x623   :  { %v1721_v62 = vpop.f32.mrf.mxu1 }
 0x624   :  { %v591_v63 = vrot.slane %v588_v57, 7  ;;  %v590_v2 = vrot.slane %v588_v57, 6  ;;  %v574_v7 = vadd.f32 %v570_v3, %v2023_v17  ;;  %v575_v10 = vadd.f32 %v571_v4, %v2025_v18 }
 0x626   :  { %594 = vrot.lane.b32.xlu0 %v591_v63, %s1897_s19  ;;  %592 = vrot.lane.b32.xlu1 %v590_v2, %s1897_s19  ;;  %v1615_v11 = vmul.f32 -1.442695, %v574_v7  ;;  %v1616_v12 = vmul.f32 -1.442695, %v575_v10 }
 0x628   :  { %1821 = vpow2.f32 %v1615_v11 }
 0x629   :  { %1823 = vpow2.f32 %v1616_v12 }
 0x635   :  { %v1822_v13 = vpop.eup %1821 }
 0x636   :  { %v1824_v14 = vpop.eup %1823  ;;  %v582_v15 = vadd.f32 1.0, %v1822_v13 }
 0x637   :  { %v583_v16 = vadd.f32 1.0, %v1824_v14 }
 0x638   :  { %1825 = vrcp.f32 %v582_v15 }
 0x639   :  { %1827 = vrcp.f32 %v583_v16 }
 0x645   :  { %v1826_v19 = vpop.eup %1825 }
 0x646   :  { %v1828_v20 = vpop.eup %1827  ;;  %v612_v41 = vsub.f32 1.0, %v1826_v19 }
 0x647   :  { %v613_v40 = vsub.f32 1.0, %v1828_v20 }
 0x698   :  { %v595_v21 = vpop.permute.xlu0 %594  ;;  %v593_v22 = vpop.permute.xlu1 %592 }
 0x699   :  { %v599_v23 = vmul.f32 %v1828_v20, %v595_v21  ;;  %v598_v24 = vmul.f32 %v1826_v19, %v593_v22 }
 0x69b   :  { %604 = vrot.lane.b32.xlu0 %v599_v23, %s1897_s19  ;;  %602 = vrot.lane.b32.xlu1 %v598_v24, %s1897_s19 }
 0x70d   :  { %v605_v25 = vpop.permute.xlu0 %604  ;;  %v603_v26 = vpop.permute.xlu1 %602 }
 0x70e   :  { %v609_v27 = vadd.f32 %v605_v25, %v2025_v18  ;;  %v608_v28 = vadd.f32 %v603_v26, %v2023_v17 }
 0x710   :  { %1829 = vtanh.f32 %v609_v27 }
 0x711   :  { %1831 = vtanh.f32 %v608_v28 }
 0x71d   :  { %v1830_v29 = vpop.eup %1829 }
 0x71e   :  { %v1832_v31 = vpop.eup %1831  ;;  %618 = vrot.lane.b32.xlu0 %v1830_v29, %s1899_s21 }
 0x71f   :  { %616 = vrot.lane.b32.xlu1 %v1832_v31, %s1899_s21 }
 0x722   :  { %628 = vrot.lane.b32.xlu0 %v625_v33, %s1900_s22 }
 0x723   :  { %626 = vrot.lane.b32.xlu1 %v624_v35, %s1900_s22 }
 0x727   :  { %639 = vperm.xlu1 %1795, %v637_v36  }
 0x790   :  { %v619_v37 = vpop.permute.xlu0 %618 }
 0x791   :  { %v617_v38 = vpop.permute.xlu1 %616  ;;  %v623_v43 = vmul.f32 %v619_v37, %v613_v40  ;;  %v805_v37 = vsel %vm804_vm14, 1, %v1898_v34 }
 0x792   :  { %v622_v47 = vmul.f32 %v617_v38, %v612_v41 }
 0x794   :  { %v629_v42 = vpop.permute.xlu0 %628 }
 0x795   :  { %v633_v45 = vmul.f32 %v1828_v20, %v629_v42  ;;  %v627_v46 = vpop.permute.xlu1 %626 }
 0x796   :  { %v632_v48 = vmul.f32 %v1826_v19, %v627_v46 }
 0x797   :  { %v635_v49 = vadd.f32 %v633_v45, %v623_v43  ;;  %v824_v45 = vsub.s32 3, %v2083_v30 }
 0x798   :  { %v634_v50 = vadd.f32 %v632_v48, %v622_v47 }
 0x799   :  { %v645_v54 = vrot.slane %v635_v49, 1  ;;  %v661_v52 = vrot.slane %v635_v49, %v656_v44 }
 0x79a   :  { %v644_v55 = vrot.slane %v634_v50, 2  ;;  %v657_v56 = vrot.slane %v634_v50, %v656_v44 }
 0x79b   :  { %v2136_v59 = vsel %vm651_vm12, %v661_v52, %v2099_v58 }
 0x79c   :  { %v2139_v60 = vsel %vm651_vm12, %v657_v56, %v2095_v53  ;;  %v646_v51 = vsel %vm313_vm4, %v645_v54, %v644_v55 }
 0x79d   :  { %647 = vrot.lane.b32.xlu0 %v646_v51, %s1899_s21 }
 0x7a2   :  { %v640_v57 = vpop.permute.xlu1 %639 }
 0x7a3   :  { %vm641_vm13 = vcmp.eq.s32.totalorder %v640_v57, 1 }
 0x80f   :  { %v648_v62 = vpop.permute.xlu0 %647 }
 0x810   :  { %v2144_v63 = vsel %vm641_vm13, %v648_v62, %v2102_v61  ;;  %vm1476_vm13 = vcmp.eq.s32.totalorder %v2083_v30, 7 }
 0x811   :  { %1731 = vmatmul.mubr.msk.f32.vlgmr.msra.gmra.mxu0 %vm170_vm6, %v2144_v63  ;;  %v793_v35 = vrot.slane %v2144_v63, 6  ;;  %v792_v36 = vrot.slane %v2144_v63, 5 }
 0x812   :  { %1745 = vmatpush3.msra.mxu0 %v1951_v1  ;;  %1752 = vmatprep.mubr.msk.f32.mxu0 %vm1896_vm2, %v1895_v0 }
 0x813   :  { %1746 = vmatprep.subr.mxu0 %v1895_v0 }
 0x814   :  { %1747 = vmatpush3.msra.mxu0 %v1969_v5 }
 0x815   :  { %1748 = vmatprep.subr.mxu0 %v1895_v0 }
 0x816   :  { %1749 = vmatpush3.msra.mxu0 %v1976_v6 }
 0x817   :  { %1750 = vmatprep.subr.mxu0 %v1895_v0 }
 0x818   :  { %1751 = vmatpush3.msra.mxu0 %v1986_v8 }
 0x819   :  { %1766 = vmatprep.subr.mxu0 %v1895_v0 }
 0x8d1   :  { %v733_v53 = vpop.f32.mrf.mxu0 }
 0x8d2   :  { %v756_v58 = vadd.f32 %v733_v53, %v2015_v9  ;;  %v738_v4 = vrot.slane %v733_v53, 5  ;;  %v739_v7 = vrot.slane %v733_v53, 6 }
 0x8d3   :  { %v1732_v61 = vpop.f32.mrf.mxu0 }
 0x8d4   :  { %v759_v2 = vrot.slane %v756_v58, 6  ;;  %v758_v3 = vrot.slane %v756_v58, 5  ;;  %v742_v10 = vadd.f32 %v738_v4, %v2023_v17  ;;  %v743_v11 = vadd.f32 %v739_v7, %v2025_v18 }
 0x8d6   :  { %762 = vrot.lane.b32.xlu0 %v759_v2, %s1897_s19  ;;  %760 = vrot.lane.b32.xlu1 %v758_v3, %s1897_s19  ;;  %v1618_v12 = vmul.f32 -1.442695, %v742_v10  ;;  %v1619_v13 = vmul.f32 -1.442695, %v743_v11 }
 0x8d8   :  { %1833 = vpow2.f32 %v1618_v12 }
 0x8d9   :  { %1835 = vpow2.f32 %v1619_v13 }
 0x8e5   :  { %v1834_v14 = vpop.eup %1833 }
 0x8e6   :  { %v1836_v15 = vpop.eup %1835  ;;  %v750_v16 = vadd.f32 1.0, %v1834_v14 }
 0x8e7   :  { %v751_v19 = vadd.f32 1.0, %v1836_v15 }
 0x8e8   :  { %1837 = vrcp.f32 %v750_v16 }
 0x8e9   :  { %1839 = vrcp.f32 %v751_v19 }
 0x8f5   :  { %v1838_v20 = vpop.eup %1837 }
 0x8f6   :  { %v1840_v21 = vpop.eup %1839  ;;  %v780_v42 = vsub.f32 1.0, %v1838_v20 }
 0x8f7   :  { %v781_v41 = vsub.f32 1.0, %v1840_v21 }
 0x948   :  { %v763_v22 = vpop.permute.xlu0 %762  ;;  %v761_v23 = vpop.permute.xlu1 %760 }
 0x949   :  { %v767_v24 = vmul.f32 %v1840_v21, %v763_v22  ;;  %v766_v25 = vmul.f32 %v1838_v20, %v761_v23 }
 0x94b   :  { %772 = vrot.lane.b32.xlu0 %v767_v24, %s1897_s19  ;;  %770 = vrot.lane.b32.xlu1 %v766_v25, %s1897_s19 }
 0x9bd   :  { %v773_v26 = vpop.permute.xlu0 %772  ;;  %v771_v27 = vpop.permute.xlu1 %770 }
 0x9be   :  { %v777_v28 = vadd.f32 %v773_v26, %v2025_v18  ;;  %v776_v29 = vadd.f32 %v771_v27, %v2023_v17 }
 0x9c0   :  { %1841 = vtanh.f32 %v777_v28 }
 0x9c1   :  { %1843 = vtanh.f32 %v776_v29 }
 0x9cd   :  { %v1842_v31 = vpop.eup %1841 }
 0x9ce   :  { %v1844_v33 = vpop.eup %1843  ;;  %786 = vrot.lane.b32.xlu0 %v1842_v31, %s1899_s21 }
 0x9cf   :  { %784 = vrot.lane.b32.xlu1 %v1844_v33, %s1899_s21 }
 0x9d2   :  { %796 = vrot.lane.b32.xlu0 %v793_v35, %s1900_s22 }
 0x9d3   :  { %794 = vrot.lane.b32.xlu1 %v792_v36, %s1900_s22 }
 0x9d7   :  { %807 = vperm.xlu1 %1795, %v805_v37  }
 0xa40   :  { %v787_v38 = vpop.permute.xlu0 %786 }
 0xa41   :  { %v785_v40 = vpop.permute.xlu1 %784  ;;  %v791_v44 = vmul.f32 %v787_v38, %v781_v41  ;;  %v973_v38 = vsel %vm972_vm1, 1, %v1898_v34 }
 0xa42   :  { %v790_v48 = vmul.f32 %v785_v40, %v780_v42 }
 0xa44   :  { %v797_v43 = vpop.permute.xlu0 %796 }
 0xa45   :  { %v801_v46 = vmul.f32 %v1840_v21, %v797_v43  ;;  %v795_v47 = vpop.permute.xlu1 %794 }
 0xa46   :  { %v800_v49 = vmul.f32 %v1838_v20, %v795_v47 }
 0xa47   :  { %v803_v50 = vadd.f32 %v801_v46, %v791_v44  ;;  %v992_v46 = vsub.s32 4, %v2083_v30 }
 0xa48   :  { %v802_v54 = vadd.f32 %v800_v49, %v790_v48 }
 0xa49   :  { %v813_v52 = vrot.slane %v803_v50, 2  ;;  %v829_v55 = vrot.slane %v803_v50, %v824_v45 }
 0xa4a   :  { %v812_v56 = vrot.slane %v802_v54, 3  ;;  %v825_v51 = vrot.slane %v802_v54, %v824_v45 }
 0xa4b   :  { %v2178_v57 = vsel %vm819_vm15, %v829_v55, %v2136_v59 }
 0xa4c   :  { %v2181_v62 = vsel %vm819_vm15, %v825_v51, %v2139_v60  ;;  %v814_v53 = vsel %vm313_vm4, %v813_v52, %v812_v56 }
 0xa4d   :  { %815 = vrot.lane.b32.xlu0 %v814_v53, %s1899_s21 }
 0xa52   :  { %v808_v58 = vpop.permute.xlu1 %807 }
 0xa53   :  { %vm809_vm0 = vcmp.eq.s32.totalorder %v808_v58, 1 }
 0xabf   :  { %v816_v61 = vpop.permute.xlu0 %815 }
 0xac0   :  { %v2186_v2 = vsel %vm809_vm0, %v816_v61, %v2144_v63  ;;  %vm1597_vm0 = vcmask 15360  }
 0xac1   :  { %1742 = vmatmul.mubr.msk.f32.vlgmr.msra.gmra.mxu1 %vm170_vm6, %v2186_v2  ;;  %v961_v36 = vrot.slane %v2186_v2, 5  ;;  %v960_v37 = vrot.slane %v2186_v2, 4 }
 0xac2   :  { %1756 = vmatpush3.msra.mxu1 %v1951_v1  ;;  %1763 = vmatprep.mubr.msk.f32.mxu1 %vm1896_vm2, %v1895_v0 }
 0xac3   :  { %1757 = vmatprep.subr.mxu1 %v1895_v0 }
 0xac4   :  { %1758 = vmatpush3.msra.mxu1 %v1969_v5 }
 0xac5   :  { %1759 = vmatprep.subr.mxu1 %v1895_v0 }
 0xac6   :  { %1760 = vmatpush3.msra.mxu1 %v1976_v6 }
 0xac7   :  { %1761 = vmatprep.subr.mxu1 %v1895_v0 }
 0xac8   :  { %1762 = vmatpush3.msra.mxu1 %v1986_v8 }
 0xb81   :  { %v901_v59 = vpop.f32.mrf.mxu1 }
 0xb82   :  { %v924_v60 = vadd.f32 %v901_v59, %v2015_v9  ;;  %v906_v7 = vrot.slane %v901_v59, 4  ;;  %v907_v10 = vrot.slane %v901_v59, 5 }
 0xb83   :  { %v1743_v63 = vpop.f32.mrf.mxu1 }
 0xb84   :  { %v927_v3 = vrot.slane %v924_v60, 5  ;;  %v926_v4 = vrot.slane %v924_v60, 4  ;;  %v910_v11 = vadd.f32 %v906_v7, %v2023_v17  ;;  %v911_v12 = vadd.f32 %v907_v10, %v2025_v18 }
 0xb86   :  { %930 = vrot.lane.b32.xlu0 %v927_v3, %s1897_s19  ;;  %928 = vrot.lane.b32.xlu1 %v926_v4, %s1897_s19  ;;  %v1621_v13 = vmul.f32 -1.442695, %v910_v11  ;;  %v1622_v14 = vmul.f32 -1.442695, %v911_v12 }
 0xb88   :  { %1845 = vpow2.f32 %v1621_v13 }
 0xb89   :  { %1847 = vpow2.f32 %v1622_v14 }
 0xb95   :  { %v1846_v15 = vpop.eup %1845 }
 0xb96   :  { %v1848_v16 = vpop.eup %1847  ;;  %v918_v19 = vadd.f32 1.0, %v1846_v15 }
 0xb97   :  { %v919_v20 = vadd.f32 1.0, %v1848_v16 }
 0xb98   :  { %1849 = vrcp.f32 %v918_v19 }
 0xb99   :  { %1851 = vrcp.f32 %v919_v20 }
 0xba5   :  { %v1850_v21 = vpop.eup %1849 }
 0xba6   :  { %v1852_v22 = vpop.eup %1851  ;;  %v948_v43 = vsub.f32 1.0, %v1850_v21 }
 0xba7   :  { %v949_v42 = vsub.f32 1.0, %v1852_v22 }
 0xbf8   :  { %v931_v23 = vpop.permute.xlu0 %930  ;;  %v929_v24 = vpop.permute.xlu1 %928 }
 0xbf9   :  { %v935_v25 = vmul.f32 %v1852_v22, %v931_v23  ;;  %v934_v26 = vmul.f32 %v1850_v21, %v929_v24 }
 0xbfb   :  { %940 = vrot.lane.b32.xlu0 %v935_v25, %s1897_s19  ;;  %938 = vrot.lane.b32.xlu1 %v934_v26, %s1897_s19 }
 0xc6d   :  { %v941_v27 = vpop.permute.xlu0 %940  ;;  %v939_v28 = vpop.permute.xlu1 %938 }
 0xc6e   :  { %v945_v29 = vadd.f32 %v941_v27, %v2025_v18  ;;  %v944_v31 = vadd.f32 %v939_v28, %v2023_v17 }
 0xc70   :  { %1853 = vtanh.f32 %v945_v29 }
 0xc71   :  { %1855 = vtanh.f32 %v944_v31 }
 0xc7d   :  { %v1854_v33 = vpop.eup %1853 }
 0xc7e   :  { %v1856_v35 = vpop.eup %1855  ;;  %954 = vrot.lane.b32.xlu0 %v1854_v33, %s1899_s21 }
 0xc7f   :  { %952 = vrot.lane.b32.xlu1 %v1856_v35, %s1899_s21 }
 0xc82   :  { %964 = vrot.lane.b32.xlu0 %v961_v36, %s1900_s22 }
 0xc83   :  { %962 = vrot.lane.b32.xlu1 %v960_v37, %s1900_s22 }
 0xc87   :  { %975 = vperm.xlu1 %1795, %v973_v38  }
 0xcf0   :  { %v955_v40 = vpop.permute.xlu0 %954 }
 0xcf1   :  { %v953_v41 = vpop.permute.xlu1 %952  ;;  %v959_v45 = vmul.f32 %v955_v40, %v949_v42  ;;  %v1160_v42 = vsub.s32 5, %v2083_v30 }
 0xcf2   :  { %v958_v49 = vmul.f32 %v953_v41, %v948_v43 }
 0xcf4   :  { %v965_v44 = vpop.permute.xlu0 %964 }
 0xcf5   :  { %v969_v47 = vmul.f32 %v1852_v22, %v965_v44  ;;  %v963_v48 = vpop.permute.xlu1 %962 }
 0xcf6   :  { %v968_v50 = vmul.f32 %v1850_v21, %v963_v48 }
 0xcf7   :  { %v971_v54 = vadd.f32 %v969_v47, %v959_v45 }
 0xcf8   :  { %v970_v52 = vadd.f32 %v968_v50, %v958_v49 }
 0xcf9   :  { %v981_v55 = vrot.slane %v971_v54, 3  ;;  %v997_v56 = vrot.slane %v971_v54, %v992_v46 }
 0xcfa   :  { %v980_v51 = vrot.slane %v970_v52, 4  ;;  %v993_v53 = vrot.slane %v970_v52, %v992_v46 }
 0xcfb   :  { %v2219_v58 = vsel %vm987_vm3, %v997_v56, %v2178_v57 }
 0xcfc   :  { %v2222_v61 = vsel %vm987_vm3, %v993_v53, %v2181_v62  ;;  %v982_v59 = vsel %vm313_vm4, %v981_v55, %v980_v51 }
 0xcfd   :  { %983 = vrot.lane.b32.xlu0 %v982_v59, %s1899_s21 }
 0xd02   :  { %v976_v60 = vpop.permute.xlu1 %975 }
 0xd03   :  { %vm977_vm5 = vcmp.eq.s32.totalorder %v976_v60, 1 }
 0xd6f   :  { %v984_v63 = vpop.permute.xlu0 %983 }
 0xd70   :  { %v2227_v3 = vsel %vm977_vm5, %v984_v63, %v2186_v2 }
 0xd71   :  { %1753 = vmatmul.mubr.msk.f32.vlgmr.msra.gmra.mxu0 %vm170_vm6, %v2227_v3  ;;  %v1129_v29 = vrot.slane %v2227_v3, 4  ;;  %v1128_v31 = vrot.slane %v2227_v3, 3 }
 0xd72   :  { %1767 = vmatpush3.msra.mxu0 %v1951_v1  ;;  %1774 = vmatprep.mubr.msk.f32.mxu0 %vm1896_vm2, %v1895_v0  ;;  %vm1140_vm2 = vcmp.gt.s32.totalorder %v2038_v39, 5 }
 0xd73   :  { %1768 = vmatprep.subr.mxu0 %v1895_v0  ;;  %v1141_v33 = vsel %vm1140_vm2, 1, %v1898_v34 }
 0xd74   :  { %1769 = vmatpush3.msra.mxu0 %v1969_v5 }
 0xd75   :  { %1770 = vmatprep.subr.mxu0 %v1895_v0 }
 0xd76   :  { %1771 = vmatpush3.msra.mxu0 %v1976_v6 }
 0xd77   :  { %1772 = vmatprep.subr.mxu0 %v1895_v0 }
 0xd78   :  { %1773 = vmatpush3.msra.mxu0 %v1986_v8 }
 0xe31   :  { %v1069_v57 = vpop.f32.mrf.mxu0 }
 0xe32   :  { %v1092_v62 = vadd.f32 %v1069_v57, %v2015_v9  ;;  %v1074_v7 = vrot.slane %v1069_v57, 3  ;;  %v1075_v5 = vrot.slane %v1069_v57, 4 }
 0xe33   :  { %v1754_v2 = vpop.f32.mrf.mxu0 }
 0xe34   :  { %v1095_v1 = vrot.slane %v1092_v62, 4  ;;  %v1094_v4 = vrot.slane %v1092_v62, 3  ;;  %v1078_v10 = vadd.f32 %v1074_v7, %v2023_v17  ;;  %v1079_v6 = vadd.f32 %v1075_v5, %v2025_v18 }
 0xe36   :  { %1098 = vrot.lane.b32.xlu0 %v1095_v1, %s1897_s19  ;;  %1096 = vrot.lane.b32.xlu1 %v1094_v4, %s1897_s19  ;;  %v1624_v11 = vmul.f32 -1.442695, %v1078_v10  ;;  %v1625_v0 = vmul.f32 -1.442695, %v1079_v6 }
 0xe38   :  { %1857 = vpow2.f32 %v1624_v11 }
 0xe39   :  { %1859 = vpow2.f32 %v1625_v0 }
 0xe45   :  { %v1858_v8 = vpop.eup %1857 }
 0xe46   :  { %v1860_v12 = vpop.eup %1859  ;;  %v1086_v13 = vadd.f32 1.0, %v1858_v8 }
 0xe47   :  { %v1087_v14 = vadd.f32 1.0, %v1860_v12 }
 0xe48   :  { %1861 = vrcp.f32 %v1086_v13 }
 0xe49   :  { %1863 = vrcp.f32 %v1087_v14 }
 0xe55   :  { %v1862_v15 = vpop.eup %1861 }
 0xe56   :  { %v1864_v16 = vpop.eup %1863  ;;  %v1116_v38 = vsub.f32 1.0, %v1862_v15 }
 0xe57   :  { %v1117_v37 = vsub.f32 1.0, %v1864_v16 }
 0xea8   :  { %v1099_v19 = vpop.permute.xlu0 %1098  ;;  %v1097_v20 = vpop.permute.xlu1 %1096 }
 0xea9   :  { %v1103_v21 = vmul.f32 %v1864_v16, %v1099_v19  ;;  %v1102_v22 = vmul.f32 %v1862_v15, %v1097_v20 }
 0xeab   :  { %1108 = vrot.lane.b32.xlu0 %v1103_v21, %s1897_s19  ;;  %1106 = vrot.lane.b32.xlu1 %v1102_v22, %s1897_s19 }
 0xf1d   :  { %v1109_v23 = vpop.permute.xlu0 %1108  ;;  %v1107_v24 = vpop.permute.xlu1 %1106 }
 0xf1e   :  { %v1113_v25 = vadd.f32 %v1109_v23, %v2025_v18  ;;  %v1112_v26 = vadd.f32 %v1107_v24, %v2023_v17 }
 0xf20   :  { %1865 = vtanh.f32 %v1113_v25 }
 0xf21   :  { %1867 = vtanh.f32 %v1112_v26 }
 0xf2d   :  { %v1866_v27 = vpop.eup %1865 }
 0xf2e   :  { %v1868_v28 = vpop.eup %1867  ;;  %1122 = vrot.lane.b32.xlu0 %v1866_v27, %s1899_s21  ;;  %v1309_v27 = vsel %vm1308_vm9, 1, %v1898_v34 }
 0xf2f   :  { %1120 = vrot.lane.b32.xlu1 %v1868_v28, %s1899_s21 }
 0xf32   :  { %1132 = vrot.lane.b32.xlu0 %v1129_v29, %s1900_s22 }
 0xf33   :  { %1130 = vrot.lane.b32.xlu1 %v1128_v31, %s1900_s22 }
 0xf37   :  { %1143 = vperm.xlu1 %1795, %v1141_v33  }
 0xfa0   :  { %v1123_v35 = vpop.permute.xlu0 %1122 }
 0xfa1   :  { %v1121_v36 = vpop.permute.xlu1 %1120  ;;  %v1127_v41 = vmul.f32 %v1123_v35, %v1117_v37  ;;  %v1328_v37 = vsub.s32 6, %v2083_v30 }
 0xfa2   :  { %v1126_v45 = vmul.f32 %v1121_v36, %v1116_v38 }
 0xfa4   :  { %v1133_v40 = vpop.permute.xlu0 %1132 }
 0xfa5   :  { %v1137_v43 = vmul.f32 %v1864_v16, %v1133_v40  ;;  %v1131_v44 = vpop.permute.xlu1 %1130 }
 0xfa6   :  { %v1136_v46 = vmul.f32 %v1862_v15, %v1131_v44 }
 0xfa7   :  { %v1139_v47 = vadd.f32 %v1137_v43, %v1127_v41 }
 0xfa8   :  { %v1138_v48 = vadd.f32 %v1136_v46, %v1126_v45 }
 0xfa9   :  { %v1149_v49 = vrot.slane %v1139_v47, 4  ;;  %v1165_v50 = vrot.slane %v1139_v47, %v1160_v42 }
 0xfaa   :  { %v1148_v54 = vrot.slane %v1138_v48, 5  ;;  %v1161_v52 = vrot.slane %v1138_v48, %v1160_v42 }
 0xfab   :  { %v2260_v55 = vsel %vm1155_vm7, %v1165_v50, %v2219_v58 }
 0xfac   :  { %v1150_v56 = vsel %vm313_vm4, %v1149_v49, %v1148_v54  ;;  %v2264_v51 = vsel %vm1155_vm7, %v1161_v52, %v2222_v61 }
 0xfad   :  { %1151 = vrot.lane.b32.xlu0 %v1150_v56, %s1899_s21 }
 0xfb2   :  { %v1144_v53 = vpop.permute.xlu1 %1143 }
 0xfb3   :  { %vm1145_vm8 = vcmp.eq.s32.totalorder %v1144_v53, 1 }
0x101f   :  { %v1152_v59 = vpop.permute.xlu0 %1151 }
0x1020   :  { %v2268_v60 = vsel %vm1145_vm8, %v1152_v59, %v2227_v3 }
0x1021   :  { %1764 = vmatmul.mubr.msk.f32.vlgmr.msra.gmra.mxu1 %vm170_vm6, %v2268_v60  ;;  %v1297_v25 = vrot.slane %v2268_v60, 3  ;;  %v1296_v26 = vrot.slane %v2268_v60, 2 }
0x10e1   :  { %v1237_v63 = vpop.f32.mrf.mxu1 }
0x10e2   :  { %v1260_v58 = vadd.f32 %v1237_v63, %v2015_v9  ;;  %v1242_v61 = vrot.slane %v1237_v63, 2  ;;  %v1243_v1 = vrot.slane %v1237_v63, 3 }
0x10e3   :  { %v1765_v57 = vpop.f32.mrf.mxu1 }
0x10e4   :  { %v1263_v62 = vrot.slane %v1260_v58, 3  ;;  %v1262_v2 = vrot.slane %v1260_v58, 2  ;;  %v1246_v4 = vadd.f32 %v1242_v61, %v2023_v17  ;;  %v1247_v3 = vadd.f32 %v1243_v1, %v2025_v18 }
0x10e6   :  { %1266 = vrot.lane.b32.xlu0 %v1263_v62, %s1897_s19  ;;  %1264 = vrot.lane.b32.xlu1 %v1262_v2, %s1897_s19  ;;  %v1627_v7 = vmul.f32 -1.442695, %v1246_v4  ;;  %v1628_v5 = vmul.f32 -1.442695, %v1247_v3 }
0x10e8   :  { %1869 = vpow2.f32 %v1627_v7  ;;  %v1901_v7 = vmov 1966171168  }
0x10e9   :  { %1871 = vpow2.f32 %v1628_v5  ;;  %v139_v5 = vunpack.c.l.s4 %v1901_v7 }
0x10f5   :  { %v1870_v10 = vpop.eup %1869 }
0x10f6   :  { %v1872_v6 = vpop.eup %1871  ;;  %v1254_v11 = vadd.f32 1.0, %v1870_v10  ;;  %v140_v10 = vunpack.c.0.s8 %v139_v5 }
0x10f7   :  { %v1255_v0 = vadd.f32 1.0, %v1872_v6 }
0x10f8   :  { %1873 = vrcp.f32 %v1254_v11  ;;  %v143_v6 = vsub.s32 %v140_v10, %v2083_v30  ;;  %v1894_v11 = vld.sshfl [vmem:[%s2358_s1] sm:$0x11 pattern:$0x75316420] }
0x10f9   :  { %1875 = vrcp.f32 %v1255_v0 }
0x1105   :  { %v1874_v8 = vpop.eup %1873 }
0x1106   :  { %v1876_v12 = vpop.eup %1875  ;;  %v1284_v33 = vsub.f32 1.0, %v1874_v8 }
0x1107   :  { %v1285_v31 = vsub.f32 1.0, %v1876_v12 }
0x1158   :  { %v1267_v13 = vpop.permute.xlu0 %1266  ;;  %v1265_v14 = vpop.permute.xlu1 %1264 }
0x1159   :  { %v1271_v15 = vmul.f32 %v1876_v12, %v1267_v13  ;;  %v1270_v16 = vmul.f32 %v1874_v8, %v1265_v14  ;;  %v145_v14 = vcombine.high %v1894_v11, %v1894_v11 }
0x115b   :  { %1276 = vrot.lane.b32.xlu0 %v1271_v15, %s1897_s19  ;;  %1274 = vrot.lane.b32.xlu1 %v1270_v16, %s1897_s19 }
0x11cd   :  { %v1277_v19 = vpop.permute.xlu0 %1276  ;;  %v1275_v20 = vpop.permute.xlu1 %1274 }
0x11ce   :  { %v1281_v21 = vadd.f32 %v1277_v19, %v2025_v18  ;;  %v1280_v22 = vadd.f32 %v1275_v20, %v2023_v17  ;;  %v159_v19 = vrot.slane %v145_v14, %v143_v6 }
0x11d0   :  { %1877 = vtanh.f32 %v1281_v21  ;;  %v167_v21 = vrot.slane %v159_v19, %v2086_v32 }
0x11d1   :  { %1879 = vtanh.f32 %v1280_v22 }
0x11dd   :  { %v1878_v23 = vpop.eup %1877 }
0x11de   :  { %v1880_v24 = vpop.eup %1879  ;;  %1290 = vrot.lane.b32.xlu0 %v1878_v23, %s1899_s21  ;;  %v152_v23 = vrot.slane %v1894_v11, %v143_v6 }
0x11df   :  { %1288 = vrot.lane.b32.xlu1 %v1880_v24, %s1899_s21 }
0x11e2   :  { %1300 = vrot.lane.b32.xlu0 %v1297_v25, %s1900_s22 }
0x11e3   :  { %1298 = vrot.lane.b32.xlu1 %v1296_v26, %s1900_s22 }
0x11e7   :  { %1311 = vperm.xlu1 %1795, %v1309_v27  }
0x1250   :  { %v1291_v28 = vpop.permute.xlu0 %1290 }
0x1251   :  { %v1289_v29 = vpop.permute.xlu1 %1288  ;;  %v1295_v36 = vmul.f32 %v1291_v28, %v1285_v31 }
0x1252   :  { %v1294_v41 = vmul.f32 %v1289_v29, %v1284_v33  ;;  %v163_v29 = vrot.slane %v152_v23, %v2086_v32 }
0x1254   :  { %v1301_v35 = vpop.permute.xlu0 %1300  ;;  %vm168_vm12 = vcmp.lt.s32.totalorder %v2083_v30, %v163_v29 }
0x1255   :  { %v1305_v38 = vmul.f32 %v1876_v12, %v1301_v35  ;;  %v1299_v40 = vpop.permute.xlu1 %1298  ;;  %v1489_v35 = vsel %vm168_vm12, 1, %v1898_v34 }
0x1256   :  { %v1304_v42 = vmul.f32 %v1874_v8, %v1299_v40 }
0x1257   :  { %v1307_v39 = vadd.f32 %v1305_v38, %v1295_v36 }
0x1258   :  { %v1306_v43 = vadd.f32 %v1304_v42, %v1294_v41 }
0x1259   :  { %v1317_v44 = vrot.slane %v1307_v39, 5  ;;  %v1333_v45 = vrot.slane %v1307_v39, %v1328_v37  ;;  %v1501_v39 = vld [vmem:[%s2359_s6] sm:$0xff] }
0x125a   :  { %v1316_v46 = vrot.slane %v1306_v43, 6  ;;  %v1329_v47 = vrot.slane %v1306_v43, %v1328_v37 }
0x125b   :  { %v2292_v48 = vsel %vm1323_vm10, %v1333_v45, %v2260_v55 }
0x125c   :  { %v1318_v49 = vsel %vm313_vm4, %v1317_v44, %v1316_v46  ;;  %v2296_v50 = vsel %vm1323_vm10, %v1329_v47, %v2264_v51  ;;  %vm169_vm4 = vcmp.lt.s32.totalorder %v2083_v30, %v167_v21  ;;  %v1481_v46 = vsub.s32 7, %v2083_v30  ;;  %v1632_v30 = vld [vmem:[%s2360_s7] ss:$0 sm:$0xff] }
0x125d   :  { %1319 = vrot.lane.b32.xlu0 %v1318_v49, %s1899_s21  ;;  %v1490_v24 = vsel %vm169_vm4, 1, %v1898_v34  ;;  %v1502_v34 = vld [vmem:[%s2359_s6 + $0x8] sm:$0xff] }
0x1262   :  { %v1312_v54 = vpop.permute.xlu1 %1311 }
0x1263   :  { %vm1313_vm11 = vcmp.eq.s32.totalorder %v1312_v54, 1 }
0x12cf   :  { %v1320_v52 = vpop.permute.xlu0 %1319 }
0x12d0   :  { %v1322_v56 = vsel %vm1313_vm11, %v1320_v52, %v2268_v60 }
0x12d1   :  { %1775 = vmatmul.mubr.msk.f32.vlgmr.msra.gmra.mxu0 %vm170_vm6, %v1322_v56  ;;  %v1464_v20 = vrot.slane %v1322_v56, 1  ;;  %v1465_v22 = vrot.slane %v1322_v56, 2 }
0x1391   :  { %v1405_v53 = vpop.f32.mrf.mxu0 }
0x1392   :  { %v1428_v59 = vadd.f32 %v1405_v53, %v2015_v9  ;;  %v1410_v51 = vrot.slane %v1405_v53, 1  ;;  %v1411_v57 = vrot.slane %v1405_v53, 2 }
0x1393   :  { %v1776_v63 = vpop.f32.mrf.mxu0 }
0x1394   :  { %v1431_v55 = vrot.slane %v1428_v59, 2  ;;  %v1430_v58 = vrot.slane %v1428_v59, 1  ;;  %v1414_v62 = vadd.f32 %v1410_v51, %v2023_v17  ;;  %v1415_v2 = vadd.f32 %v1411_v57, %v2025_v18 }
0x1396   :  { %1434 = vrot.lane.b32.xlu0 %v1431_v55, %s1897_s19  ;;  %1432 = vrot.lane.b32.xlu1 %v1430_v58, %s1897_s19  ;;  %v1630_v61 = vmul.f32 -1.442695, %v1414_v62  ;;  %v1631_v60 = vmul.f32 -1.442695, %v1415_v2 }
0x1398   :  { %1881 = vpow2.f32 %v1630_v61 }
0x1399   :  { %1883 = vpow2.f32 %v1631_v60 }
0x13a5   :  { %v1882_v1 = vpop.eup %1881 }
0x13a6   :  { %v1884_v4 = vpop.eup %1883  ;;  %v1422_v9 = vadd.f32 1.0, %v1882_v1 }
0x13a7   :  { %v1423_v3 = vadd.f32 1.0, %v1884_v4 }
0x13a8   :  { %1885 = vrcp.f32 %v1422_v9 }
0x13a9   :  { %1887 = vrcp.f32 %v1423_v3 }
0x13b5   :  { %v1886_v0 = vpop.eup %1885 }
0x13b6   :  { %v1888_v8 = vpop.eup %1887  ;;  %v1452_v37 = vsub.f32 1.0, %v1886_v0 }
0x13b7   :  { %v1453_v41 = vsub.f32 1.0, %v1888_v8 }
0x1408   :  { %v1435_v12 = vpop.permute.xlu0 %1434  ;;  %v1433_v13 = vpop.permute.xlu1 %1432 }
0x1409   :  { %v1439_v15 = vmul.f32 %v1888_v8, %v1435_v12  ;;  %v1438_v16 = vmul.f32 %v1886_v0, %v1433_v13 }
0x140b   :  { %1444 = vrot.lane.b32.xlu0 %v1439_v15, %s1897_s19  ;;  %1442 = vrot.lane.b32.xlu1 %v1438_v16, %s1897_s19 }
0x140f   :  { %1466 = vrot.lane.b32.xlu0 %v1464_v20, %s1900_s22 }
0x1413   :  { %1468 = vrot.lane.b32.xlu0 %v1465_v22, %s1900_s22 }
0x1417   :  { %1495 = vperm.xlu0 %1796, %v1490_v24  }
0x147d   :  { %v1443_v25 = vpop.permute.xlu1 %1442  ;;  %v1445_v26 = vpop.permute.xlu0 %1444 }
0x147e   :  { %v1448_v27 = vadd.f32 %v1443_v25, %v2023_v17  ;;  %v1449_v28 = vadd.f32 %v1445_v26, %v2025_v18  ;;  %v1504_v17 = vld [vmem:[%s2359_s6 + $0x18] sm:$0xff]  ;;  %v1503_v18 = vld [vmem:[%s2359_s6 + $0x10] sm:$0xff] }
0x147f   :  { %1777 = vmatprep.subr.mxu1 %v1504_v17 }
0x1480   :  { %1889 = vtanh.f32 %v1448_v27  ;;  %1778 = vmatpush3.msra.mxu1 %v1504_v17 }
0x1481   :  { %1891 = vtanh.f32 %v1449_v28  ;;  %1779 = vmatprep.subr.mxu1 %v1503_v18  ;;  %v1467_v36 = vpop.permute.xlu0 %1466 }
0x1482   :  { %1780 = vmatpush3.msra.mxu1 %v1503_v18  ;;  %v1472_v43 = vmul.f32 %v1886_v0, %v1467_v36 }
0x1483   :  { %1781 = vmatprep.subr.mxu1 %v1502_v34 }
0x1484   :  { %1782 = vmatpush3.msra.mxu1 %v1502_v34 }
0x1485   :  { %v1469_v42 = vpop.permute.xlu0 %1468  ;;  %1783 = vmatprep.subr.mxu1 %v1501_v39 }
0x1486   :  { %v1473_v45 = vmul.f32 %v1888_v8, %v1469_v42  ;;  %1784 = vmatpush3.msra.mxu1 %v1501_v39 }
0x148d   :  { %v1890_v31 = vpop.eup %1889 }
0x148e   :  { %1456 = vrot.lane.b32.xlu1 %v1890_v31, %s1899_s21  ;;  %v1892_v33 = vpop.eup %1891 }
0x1492   :  { %1458 = vrot.lane.b32.xlu1 %v1892_v33, %s1899_s21  ;;  %v1496_v56 = vpop.permute.xlu0 %1495 }
0x1493   :  { %vm1498_vm15 = vcmp.eq.s32.totalorder %v1496_v56, 1 }
0x1496   :  { %1492 = vperm.xlu1 %1795, %v1489_v35  }
0x1500   :  { %v1457_v32 = vpop.permute.xlu1 %1456 }
0x1501   :  { %v1462_v40 = vmul.f32 %v1457_v32, %v1452_v37 }
0x1503   :  { %v1474_v47 = vadd.f32 %v1472_v43, %v1462_v40 }
0x1504   :  { %v1459_v38 = vpop.permute.xlu1 %1458 }
0x1505   :  { %v1463_v44 = vmul.f32 %v1459_v38, %v1453_v41  ;;  %v1482_v54 = vrot.slane %v1474_v47, %v1481_v46 }
0x1507   :  { %v1475_v49 = vadd.f32 %v1473_v45, %v1463_v44  ;;  %v1487_v59 = vsel %vm1476_vm13, %v1482_v54, %v2296_v50 }
0x1509   :  { %v1486_v52 = vrot.slane %v1475_v49, %v1481_v46 }
0x150b   :  { %v1488_v55 = vsel %vm1476_vm13, %v1486_v52, %v2292_v48 }
0x150c   :  { %v1500_v58 = vsel %vm1498_vm15, %v1488_v55, 0.0 }
0x1511   :  { %v1493_v53 = vpop.permute.xlu1 %1492 }
0x1512   :  { %vm1497_vm14 = vcmp.eq.s32.totalorder %v1493_v53, 1 }
0x1513   :  { %v1499_v63 = vsel %vm1497_vm14, %v1487_v59, 0.0 }
0x1514   :  { %1514 = vrot.lane.b32.xlu1 %v1499_v63, %s1899_s21 }
0x1518   :  { %1516 = vrot.lane.b32.xlu1 %v1500_v58, %s1899_s21 }
0x1586   :  { %v1515_v51 = vpop.permute.xlu1 %1514 }
0x1587   :  { %1785 = vmatprep.mubr.msk.f32.mxu1 %vm170_vm6, %v1515_v51 }
0x158a   :  { %v1517_v57 = vpop.permute.xlu1 %1516 }
0x158b   :  { %1786 = vmatmul.mubr.msk.f32.vlgmr.msra.gmra.mxu1 %vm170_vm6, %v1517_v57 }
0x164b   :  { %v1787_v50 = vpop.f32.mrf.mxu1 }
0x164c   :  { %v1594_v62 = vadd.f32 %v1787_v50, %v1632_v30 }
0x164d   :  { %v1588_v48 = vpop.f32.mrf.mxu1 }
0x164e   :  { %1599 = vst.msk [vmem:[%s2361_s8 + $0x8] sm:$0xff] %vm1597_vm0, %v1594_v62  ;;  %v1589_v2 = vadd.f32 %v1632_v30, %v1588_v48 }
0x1650   :  { %1598 = vst.msk [vmem:[%s2361_s8] sm:$0xff] %vm1597_vm0, %v1589_v2 }

</bundles_post_ra>
